<compile_context>
chip_gen: v5e
topology: v5e:2x2
jax: 0.10.0
libtpu: 0.0.40
codegen_flags: <defaults>
</compile_context>

<pallas_src>
import jax
import jax.numpy as jnp
from jax.experimental import pallas as pl
from jax.experimental.pallas import tpu as pltpu

BN_EPS = 1e-5
LEAKY_SLOPE = 0.01


def _leaky_relu(x, slope=LEAKY_SLOPE):
    return jnp.where(x >= 0, x, slope * x)


# ----------------------------------------------------------------------------
# Fused kernel: all LSTM layers (wavefront-interleaved) + MLP head in one
# program.  Everything (inputs, weights, h/c state) is VMEM/vreg-resident;
# only the final (B, output_size) result is written to HBM.
# ----------------------------------------------------------------------------
def make_fused_kernel(num_layers, T, B, din0, units):
    def kernel(*refs):
        idx = 0
        x_ref = refs[idx]; idx += 1                      # (T*B, din0)
        l0_wih_ref, l0_whh_ref, l0_b_ref = refs[idx:idx + 3]; idx += 3
        stack_refs = []                                  # layers 1..L-1
        for _ in range(num_layers - 1):
            stack_refs.append(refs[idx:idx + 2]); idx += 2   # (w_stack, bias)
        w1_ref, b1_ref, w2_ref, b2_ref, w3_ref, b3_ref = refs[idx:idx + 6]; idx += 6
        o_ref = refs[idx]

        # ---- layer-0 input projection for ALL timesteps, off the serial path.
        # din0 == 1 -> (T*B,1) x (1,4H) is an outer product: VPU broadcast mul.
        x2d = x_ref[...]
        if din0 == 1:
            gx0 = x2d * l0_wih_ref[...] + l0_b_ref[...]
        else:
            gx0 = (jnp.dot(x2d, l0_wih_ref[...],
                           preferred_element_type=jnp.float32) + l0_b_ref[...])
        whh0 = l0_whh_ref[...]

        # Load the stacked [W_ih; W_hh] weights / biases once (hoisted).
        wstack = [s[0][...] for s in stack_refs]
        bstack = [s[1][...] for s in stack_refs]

        h = [jnp.zeros((B, units[l]), jnp.float32) for l in range(num_layers)]
        c = [jnp.zeros((B, units[l]), jnp.float32) for l in range(num_layers)]
        out_h = [None] * num_layers   # layer l's h at its most recent timestep

        def lstm_cell(gates, c_l, H):
            # g-gate columns were pre-scaled by 2 at parameter-prep time, so a
            # single full-vreg sigmoid covers i/f/o and gives tanh via 2s-1.
            s = jax.nn.sigmoid(gates)
            i_g = s[:, 0 * H:1 * H]
            f_g = s[:, 1 * H:2 * H]
            g_g = 2.0 * s[:, 2 * H:3 * H] - 1.0          # tanh(x) = 2*sigmoid(2x)-1
            o_g = s[:, 3 * H:4 * H]
            c_new = f_g * c_l + i_g * g_g
            h_new = o_g * jnp.tanh(c_new)
            return h_new, c_new

        # ---- wavefront over (layer, time): cells with l + t == wave are
        # independent of each other, so their traced op chains interleave.
        num_waves = T + num_layers - 1
        for wave in range(num_waves):
            prev_out = list(out_h)    # snapshot: read previous wave's outputs
            for l in range(num_layers):
                t = wave - l
                if t < 0 or t >= T:
                    continue
                H = units[l]
                if l == 0:
                    gates = (gx0[t * B:(t + 1) * B, :]
                             + jnp.dot(h[0], whh0,
                                       preferred_element_type=jnp.float32))
                else:
                    # One fused matmul per step: [BN-folded x_t ; h_t-1] @ [W_ih; W_hh]
                    lhs = jnp.concatenate([prev_out[l - 1], h[l]], axis=1)
                    gates = (jnp.dot(lhs, wstack[l - 1],
                                     preferred_element_type=jnp.float32)
                             + bstack[l - 1])
                h[l], c[l] = lstm_cell(gates, c[l], H)
                out_h[l] = h[l]

        # ---- dense head; last layer's BN is already folded into dense1.
        x_last = out_h[-1]                                    # (B, H_last)
        h1 = jnp.dot(x_last, w1_ref[...], preferred_element_type=jnp.float32) + b1_ref[...]
        h1 = _leaky_relu(h1)
        h2 = jnp.dot(h1, w2_ref[...], preferred_element_type=jnp.float32) + b2_ref[...]
        h2 = _leaky_relu(h2)
        out = jnp.dot(h2, w3_ref[...], preferred_element_type=jnp.float32) + b3_ref[...]
        o_ref[...] = out.astype(o_ref.dtype)

    return kernel


def _full_spec(shape):
    n = len(shape)
    return pl.BlockSpec(shape, lambda i, n=n: (0,) * n)


# ----------------------------------------------------------------------------
# Parameter init (stand-in for the PyTorch module's weights)
# ----------------------------------------------------------------------------
def init_params(key, input_size, lstm_units, dense_units, output_size):
    params = {"lstm": [], "bn": []}
    d_in = input_size
    for units in lstm_units:
        key, k1, k2, k3, k4, k5, k6, k7, k8 = jax.random.split(key, 9)
        s = 1.0 / jnp.sqrt(jnp.float32(units))
        params["lstm"].append({
            "w_ih_t": jax.random.uniform(k1, (d_in, 4 * units), jnp.float32, -s, s),
            "w_hh_t": jax.random.uniform(k2, (units, 4 * units), jnp.float32, -s, s),
            "bias": (jax.random.uniform(k3, (1, 4 * units), jnp.float32, -s, s)
                     + jax.random.uniform(k4, (1, 4 * units), jnp.float32, -s, s)),
        })
        params["bn"].append({
            "gamma": jax.random.uniform(k5, (1, units), jnp.float32, 0.5, 1.5),
            "beta": jax.random.uniform(k6, (1, units), jnp.float32, -0.1, 0.1),
            "mean": jax.random.uniform(k7, (1, units), jnp.float32, -0.1, 0.1),
            "var": jax.random.uniform(k8, (1, units), jnp.float32, 0.5, 1.5),
        })
        d_in = units

    def linear(key, fan_in, fan_out):
        k1, k2 = jax.random.split(key)
        s = 1.0 / jnp.sqrt(jnp.float32(fan_in))
        w_t = jax.random.uniform(k1, (fan_in, fan_out), jnp.float32, -s, s)
        b = jax.random.uniform(k2, (1, fan_out), jnp.float32, -s, s)
        return w_t, b

    key, kd1, kd2, kd3 = jax.random.split(key, 4)
    params["dense1"] = linear(kd1, lstm_units[-1], dense_units)
    params["dense2"] = linear(kd2, dense_units, 32)
    params["dense3"] = linear(kd3, 32, output_size)
    return params


def bn_affine(bn):
    scale = bn["gamma"] * jax.lax.rsqrt(bn["var"] + BN_EPS)
    shift = bn["beta"] - bn["mean"] * scale
    return scale, shift


def prepare_fused_params(params):
    """One-time weight preparation (NOT on the per-call hot path):
      * fold eval-mode BatchNorm of layer l into layer l+1's W_ih / bias
        (and the last layer's BN into dense1),
      * stack [W_ih; W_hh] for layers > 0 so each recurrence step is a single
        (B, H_prev+H) x (H_prev+H, 4H) matmul,
      * pre-scale the g-gate (tanh) columns by 2 so the kernel can use one
        full-width sigmoid and recover tanh as 2*sigmoid(2x) - 1.
    """
    lstm, bn = params["lstm"], params["bn"]
    num_layers = len(lstm)
    units = [p["w_hh_t"].shape[0] for p in lstm]

    def scale_g_cols(w, H):
        g_scale = jnp.concatenate(
            [jnp.ones((1, 2 * H), jnp.float32),
             jnp.full((1, H), 2.0, jnp.float32),
             jnp.ones((1, H), jnp.float32)], axis=1)
        return w * g_scale

    fused = {}
    # layer 0 (no BN on its input)
    H0 = units[0]
    fused["l0_w_ih"] = scale_g_cols(lstm[0]["w_ih_t"], H0)
    fused["l0_w_hh"] = scale_g_cols(lstm[0]["w_hh_t"], H0)
    fused["l0_bias"] = scale_g_cols(lstm[0]["bias"], H0)

    # layers 1..L-1: fold previous layer's BN, then stack [W_ih; W_hh]
    fused["stacks"] = []
    for l in range(1, num_layers):
        H = units[l]
        scale, shift = bn_affine(bn[l - 1])                 # (1, H_prev)
        w_ih = lstm[l]["w_ih_t"] * scale.T                  # row k scaled by scale[k]
        bias = lstm[l]["bias"] + shift @ lstm[l]["w_ih_t"]
        w_ih = scale_g_cols(w_ih, H)
        w_hh = scale_g_cols(lstm[l]["w_hh_t"], H)
        bias = scale_g_cols(bias, H)
        fused["stacks"].append((jnp.concatenate([w_ih, w_hh], axis=0), bias))

    # head: fold the last layer's BN into dense1
    scale, shift = bn_affine(bn[-1])
    w1, b1 = params["dense1"]
    fused["dense1"] = (w1 * scale.T, b1 + shift @ w1)
    fused["dense2"] = params["dense2"]
    fused["dense3"] = params["dense3"]
    return fused


# ----------------------------------------------------------------------------
# Forward pass (single pallas_call)
# ----------------------------------------------------------------------------
@jax.jit
def lstm_model_forward(x_btd, fused):
    """x_btd: (B, T, input_size) batch-first, like the PyTorch module.
    `fused` is the output of prepare_fused_params (BN folded, gates pre-scaled)."""
    B, T, din0 = x_btd.shape
    # time-major, flattened to a 2-D lane-friendly slab; no in-kernel reshapes
    x2d = jnp.transpose(x_btd, (1, 0, 2)).reshape(T * B, din0).astype(jnp.float32)

    units = (fused["l0_w_hh"].shape[0],) + tuple(
        ws.shape[1] // 4 for ws, _ in fused["stacks"])
    num_layers = len(units)
    out_size = fused["dense3"][0].shape[1]

    args = [x2d, fused["l0_w_ih"], fused["l0_w_hh"], fused["l0_bias"]]
    for w_stack, bias in fused["stacks"]:
        args += [w_stack, bias]
    args += [*fused["dense1"], *fused["dense2"], *fused["dense3"]]
    specs = [_full_spec(a.shape) for a in args]

    # VMEM budget guard: everything is resident (double-buffered by BlockSpec),
    # so size the scoped limit from the footprint with generous headroom.
    arg_bytes = sum(a.size * a.dtype.itemsize for a in args) + B * out_size * 4
    vmem_limit = int(min(32 << 20, max(16 << 20, 8 * arg_bytes)))

    kernel = make_fused_kernel(num_layers, T, B, din0, units)

    return pl.pallas_call(
        kernel,
        out_shape=jax.ShapeDtypeStruct((B, out_size), jnp.float32),
        grid=(1,),
        in_specs=specs,
        out_specs=_full_spec((B, out_size)),
        compiler_params=pltpu.CompilerParams(
            dimension_semantics=("arbitrary",),
            vmem_limit_bytes=vmem_limit),
    )(*args)


# ----------------------------------------------------------------------------
# Pure-JAX reference (un-fused parameters) for a correctness check
# ----------------------------------------------------------------------------
def lstm_model_ref(x_btd, params):
    x = jnp.transpose(x_btd, (1, 0, 2)).astype(jnp.float32)
    for lstm_p, bn_p in zip(params["lstm"], params["bn"]):
        H = lstm_p["w_hh_t"].shape[0]
        B = x.shape[1]
        scale, shift = bn_affine(bn_p)

        def step(carry, x_t, p=lstm_p, H=H):
            h, c = carry
            gates = x_t @ p["w_ih_t"] + h @ p["w_hh_t"] + p["bias"]
            i = jax.nn.sigmoid(gates[:, 0 * H:1 * H])
            f = jax.nn.sigmoid(gates[:, 1 * H:2 * H])
            g = jnp.tanh(gates[:, 2 * H:3 * H])
            o = jax.nn.sigmoid(gates[:, 3 * H:4 * H])
            c = f * c + i * g
            h = o * jnp.tanh(c)
            return (h, c), h

        init = (jnp.zeros((B, H), jnp.float32), jnp.zeros((B, H), jnp.float32))
        _, hs = jax.lax.scan(step, init, x)
        x = hs * scale + shift
    x_last = x[-1]
    w1, b1 = params["dense1"]
    w2, b2 = params["dense2"]
    w3, b3 = params["dense3"]
    h1 = _leaky_relu(x_last @ w1 + b1)
    h2 = _leaky_relu(h1 @ w2 + b2)
    return h2 @ w3 + b3


if __name__ == "__main__":
    # Small shapes consistent with the module's forward:
    # x: [batch, seq_len, input_size] with input_size=1
    B, T, INPUT_SIZE = 8, 8, 1
    HIDDEN = 32
    NUM_LAYERS = 2
    LSTM_UNITS = [HIDDEN] * NUM_LAYERS
    DENSE_UNITS = 64
    OUTPUT_SIZE = 4

    key = jax.random.PRNGKey(0)
    k_x, k_p = jax.random.split(key)
    x = jax.random.normal(k_x, (B, T, INPUT_SIZE), jnp.float32)
    params = init_params(k_p, INPUT_SIZE, LSTM_UNITS, DENSE_UNITS, OUTPUT_SIZE)

    # One-time parameter prep (BN fold + [W_ih;W_hh] stacking + g-gate scaling)
    fused = prepare_fused_params(params)

    out = lstm_model_forward(x, fused)
    out = jax.block_until_ready(out)
    assert out.shape == (B, OUTPUT_SIZE), out.shape

    ref = jax.block_until_ready(lstm_model_ref(x, params))
    assert jnp.all(jnp.isfinite(out))
    assert jnp.allclose(out, ref, atol=2e-3, rtol=2e-3), (out, ref)

    print("KERNEL_OK")
</pallas_src>

<mosaic_0001>
module attributes {stable_mosaic.version = 11 : i64} {
  func.func @kernel(%arg0: i32, %arg1: memref<64x1xf32, #tpu.memory_space<vmem>>, %arg2: memref<1x128xf32, #tpu.memory_space<vmem>>, %arg3: memref<32x128xf32, #tpu.memory_space<vmem>>, %arg4: memref<1x128xf32, #tpu.memory_space<vmem>>, %arg5: memref<64x128xf32, #tpu.memory_space<vmem>>, %arg6: memref<1x128xf32, #tpu.memory_space<vmem>>, %arg7: memref<32x64xf32, #tpu.memory_space<vmem>>, %arg8: memref<1x64xf32, #tpu.memory_space<vmem>>, %arg9: memref<64x32xf32, #tpu.memory_space<vmem>>, %arg10: memref<1x32xf32, #tpu.memory_space<vmem>>, %arg11: memref<32x4xf32, #tpu.memory_space<vmem>>, %arg12: memref<1x4xf32, #tpu.memory_space<vmem>>, %arg13: memref<8x4xf32, #tpu.memory_space<vmem>>) attributes {dimension_semantics = [#tpu.dimension_semantics<arbitrary>], iteration_bounds = array<i64: 1>, scalar_prefetch = 0 : i64, scratch_operands = 0 : i64, tpu.core_type = #tpu.core_type<tc>, window_params = [{pipeline_mode = #tpu.pipeline_mode<synchronous>, transform_indices = @transform_0, window_bounds = array<i64: 64, 1>}, {pipeline_mode = #tpu.pipeline_mode<synchronous>, transform_indices = @transform_1, window_bounds = array<i64: 1, 128>}, {pipeline_mode = #tpu.pipeline_mode<synchronous>, transform_indices = @transform_2, window_bounds = array<i64: 32, 128>}, {pipeline_mode = #tpu.pipeline_mode<synchronous>, transform_indices = @transform_3, window_bounds = array<i64: 1, 128>}, {pipeline_mode = #tpu.pipeline_mode<synchronous>, transform_indices = @transform_4, window_bounds = array<i64: 64, 128>}, {pipeline_mode = #tpu.pipeline_mode<synchronous>, transform_indices = @transform_5, window_bounds = array<i64: 1, 128>}, {pipeline_mode = #tpu.pipeline_mode<synchronous>, transform_indices = @transform_6, window_bounds = array<i64: 32, 64>}, {pipeline_mode = #tpu.pipeline_mode<synchronous>, transform_indices = @transform_7, window_bounds = array<i64: 1, 64>}, {pipeline_mode = #tpu.pipeline_mode<synchronous>, transform_indices = @transform_8, window_bounds = array<i64: 64, 32>}, {pipeline_mode = #tpu.pipeline_mode<synchronous>, transform_indices = @transform_9, window_bounds = array<i64: 1, 32>}, {pipeline_mode = #tpu.pipeline_mode<synchronous>, transform_indices = @transform_10, window_bounds = array<i64: 32, 4>}, {pipeline_mode = #tpu.pipeline_mode<synchronous>, transform_indices = @transform_11, window_bounds = array<i64: 1, 4>}, {pipeline_mode = #tpu.pipeline_mode<synchronous>, transform_indices = @transform_12, window_bounds = array<i64: 8, 4>}]} {
    %c0 = arith.constant 0 : index
    %c0_0 = arith.constant 0 : index
    %0 = vector.load %arg1[%c0, %c0_0] : memref<64x1xf32, #tpu.memory_space<vmem>>, vector<64x1xf32>
    %c0_1 = arith.constant 0 : index
    %c0_2 = arith.constant 0 : index
    %1 = vector.load %arg2[%c0_1, %c0_2] : memref<1x128xf32, #tpu.memory_space<vmem>>, vector<1x128xf32>
    %2 = vector.broadcast %0 : vector<64x1xf32> to vector<64x128xf32>
    %3 = vector.broadcast %1 : vector<1x128xf32> to vector<64x128xf32>
    %4 = arith.mulf %2, %3 : vector<64x128xf32>
    %c0_3 = arith.constant 0 : index
    %c0_4 = arith.constant 0 : index
    %5 = vector.load %arg4[%c0_3, %c0_4] : memref<1x128xf32, #tpu.memory_space<vmem>>, vector<1x128xf32>
    %6 = vector.broadcast %5 : vector<1x128xf32> to vector<64x128xf32>
    %7 = arith.addf %4, %6 : vector<64x128xf32>
    %c0_5 = arith.constant 0 : index
    %c0_6 = arith.constant 0 : index
    %8 = vector.load %arg3[%c0_5, %c0_6] : memref<32x128xf32, #tpu.memory_space<vmem>>, vector<32x128xf32>
    %c0_7 = arith.constant 0 : index
    %c0_8 = arith.constant 0 : index
    %9 = vector.load %arg5[%c0_7, %c0_8] : memref<64x128xf32, #tpu.memory_space<vmem>>, vector<64x128xf32>
    %c0_9 = arith.constant 0 : index
    %c0_10 = arith.constant 0 : index
    %10 = vector.load %arg6[%c0_9, %c0_10] : memref<1x128xf32, #tpu.memory_space<vmem>>, vector<1x128xf32>
    %cst = arith.constant 0.000000e+00 : f32
    %11 = vector.broadcast %cst : f32 to vector<8x32xf32>
    %cst_11 = arith.constant 0.000000e+00 : f32
    %12 = vector.broadcast %cst_11 : f32 to vector<8x32xf32>
    %cst_12 = arith.constant 0.000000e+00 : f32
    %13 = vector.broadcast %cst_12 : f32 to vector<8x32xf32>
    %cst_13 = arith.constant 0.000000e+00 : f32
    %14 = vector.broadcast %cst_13 : f32 to vector<8x32xf32>
    %15 = vector.extract_strided_slice %7 {offsets = [0, 0], sizes = [8, 128], strides = [1, 1]} : vector<64x128xf32> to vector<8x128xf32>
    %cst_14 = arith.constant dense<0.000000e+00> : vector<8x128xf32>
    %16 = tpu.matmul %11, %8, %cst_14 {dimension_numbers = #tpu.dot_dimension_numbers<[1], [0], [0], [1], [0, 0, 1, 1], [], []>} : vector<8x32xf32>, vector<32x128xf32>, vector<8x128xf32> -> vector<8x128xf32>
    %17 = arith.addf %15, %16 : vector<8x128xf32>
    %18 = arith.negf %17 : vector<8x128xf32>
    %19 = math.exp %18 : vector<8x128xf32>
    %cst_15 = arith.constant 1.000000e+00 : f32
    %20 = vector.broadcast %cst_15 : f32 to vector<8x128xf32>
    %21 = arith.addf %20, %19 : vector<8x128xf32>
    %22 = arith.divf %20, %21 : vector<8x128xf32>
    %23 = vector.extract_strided_slice %22 {offsets = [0, 0], sizes = [8, 32], strides = [1, 1]} : vector<8x128xf32> to vector<8x32xf32>
    %24 = vector.extract_strided_slice %22 {offsets = [0, 32], sizes = [8, 32], strides = [1, 1]} : vector<8x128xf32> to vector<8x32xf32>
    %25 = vector.extract_strided_slice %22 {offsets = [0, 64], sizes = [8, 32], strides = [1, 1]} : vector<8x128xf32> to vector<8x32xf32>
    %cst_16 = arith.constant 2.000000e+00 : f32
    %26 = vector.broadcast %cst_16 : f32 to vector<8x32xf32>
    %27 = arith.mulf %26, %25 : vector<8x32xf32>
    %cst_17 = arith.constant 1.000000e+00 : f32
    %28 = vector.broadcast %cst_17 : f32 to vector<8x32xf32>
    %29 = arith.subf %27, %28 : vector<8x32xf32>
    %30 = vector.extract_strided_slice %22 {offsets = [0, 96], sizes = [8, 32], strides = [1, 1]} : vector<8x128xf32> to vector<8x32xf32>
    %31 = arith.mulf %24, %13 : vector<8x32xf32>
    %32 = arith.mulf %23, %29 : vector<8x32xf32>
    %33 = arith.addf %31, %32 : vector<8x32xf32>
    %34 = math.tanh %33 : vector<8x32xf32>
    %35 = arith.mulf %30, %34 : vector<8x32xf32>
    %36 = vector.extract_strided_slice %7 {offsets = [8, 0], sizes = [8, 128], strides = [1, 1]} : vector<64x128xf32> to vector<8x128xf32>
    %cst_18 = arith.constant dense<0.000000e+00> : vector<8x128xf32>
    %37 = tpu.matmul %35, %8, %cst_18 {dimension_numbers = #tpu.dot_dimension_numbers<[1], [0], [0], [1], [0, 0, 1, 1], [], []>} : vector<8x32xf32>, vector<32x128xf32>, vector<8x128xf32> -> vector<8x128xf32>
    %38 = arith.addf %36, %37 : vector<8x128xf32>
    %39 = arith.negf %38 : vector<8x128xf32>
    %40 = math.exp %39 : vector<8x128xf32>
    %cst_19 = arith.constant 1.000000e+00 : f32
    %41 = vector.broadcast %cst_19 : f32 to vector<8x128xf32>
    %42 = arith.addf %41, %40 : vector<8x128xf32>
    %43 = arith.divf %41, %42 : vector<8x128xf32>
    %44 = vector.extract_strided_slice %43 {offsets = [0, 0], sizes = [8, 32], strides = [1, 1]} : vector<8x128xf32> to vector<8x32xf32>
    %45 = vector.extract_strided_slice %43 {offsets = [0, 32], sizes = [8, 32], strides = [1, 1]} : vector<8x128xf32> to vector<8x32xf32>
    %46 = vector.extract_strided_slice %43 {offsets = [0, 64], sizes = [8, 32], strides = [1, 1]} : vector<8x128xf32> to vector<8x32xf32>
    %cst_20 = arith.constant 2.000000e+00 : f32
    %47 = vector.broadcast %cst_20 : f32 to vector<8x32xf32>
    %48 = arith.mulf %47, %46 : vector<8x32xf32>
    %cst_21 = arith.constant 1.000000e+00 : f32
    %49 = vector.broadcast %cst_21 : f32 to vector<8x32xf32>
    %50 = arith.subf %48, %49 : vector<8x32xf32>
    %51 = vector.extract_strided_slice %43 {offsets = [0, 96], sizes = [8, 32], strides = [1, 1]} : vector<8x128xf32> to vector<8x32xf32>
    %52 = arith.mulf %45, %33 : vector<8x32xf32>
    %53 = arith.mulf %44, %50 : vector<8x32xf32>
    %54 = arith.addf %52, %53 : vector<8x32xf32>
    %55 = math.tanh %54 : vector<8x32xf32>
    %56 = arith.mulf %51, %55 : vector<8x32xf32>
    %57 = tpu.concatenate %35, %12 in 1 : vector<8x32xf32>, vector<8x32xf32> -> vector<8x64xf32>
    %cst_22 = arith.constant dense<0.000000e+00> : vector<8x128xf32>
    %58 = tpu.matmul %57, %9, %cst_22 {dimension_numbers = #tpu.dot_dimension_numbers<[1], [0], [0], [1], [0, 0, 1, 1], [], []>} : vector<8x64xf32>, vector<64x128xf32>, vector<8x128xf32> -> vector<8x128xf32>
    %59 = vector.broadcast %10 : vector<1x128xf32> to vector<8x128xf32>
    %60 = arith.addf %58, %59 : vector<8x128xf32>
    %61 = arith.negf %60 : vector<8x128xf32>
    %62 = math.exp %61 : vector<8x128xf32>
    %cst_23 = arith.constant 1.000000e+00 : f32
    %63 = vector.broadcast %cst_23 : f32 to vector<8x128xf32>
    %64 = arith.addf %63, %62 : vector<8x128xf32>
    %65 = arith.divf %63, %64 : vector<8x128xf32>
    %66 = vector.extract_strided_slice %65 {offsets = [0, 0], sizes = [8, 32], strides = [1, 1]} : vector<8x128xf32> to vector<8x32xf32>
    %67 = vector.extract_strided_slice %65 {offsets = [0, 32], sizes = [8, 32], strides = [1, 1]} : vector<8x128xf32> to vector<8x32xf32>
    %68 = vector.extract_strided_slice %65 {offsets = [0, 64], sizes = [8, 32], strides = [1, 1]} : vector<8x128xf32> to vector<8x32xf32>
    %cst_24 = arith.constant 2.000000e+00 : f32
    %69 = vector.broadcast %cst_24 : f32 to vector<8x32xf32>
    %70 = arith.mulf %69, %68 : vector<8x32xf32>
    %cst_25 = arith.constant 1.000000e+00 : f32
    %71 = vector.broadcast %cst_25 : f32 to vector<8x32xf32>
    %72 = arith.subf %70, %71 : vector<8x32xf32>
    %73 = vector.extract_strided_slice %65 {offsets = [0, 96], sizes = [8, 32], strides = [1, 1]} : vector<8x128xf32> to vector<8x32xf32>
    %74 = arith.mulf %67, %14 : vector<8x32xf32>
    %75 = arith.mulf %66, %72 : vector<8x32xf32>
    %76 = arith.addf %74, %75 : vector<8x32xf32>
    %77 = math.tanh %76 : vector<8x32xf32>
    %78 = arith.mulf %73, %77 : vector<8x32xf32>
    %79 = vector.extract_strided_slice %7 {offsets = [16, 0], sizes = [8, 128], strides = [1, 1]} : vector<64x128xf32> to vector<8x128xf32>
    %cst_26 = arith.constant dense<0.000000e+00> : vector<8x128xf32>
    %80 = tpu.matmul %56, %8, %cst_26 {dimension_numbers = #tpu.dot_dimension_numbers<[1], [0], [0], [1], [0, 0, 1, 1], [], []>} : vector<8x32xf32>, vector<32x128xf32>, vector<8x128xf32> -> vector<8x128xf32>
    %81 = arith.addf %79, %80 : vector<8x128xf32>
    %82 = arith.negf %81 : vector<8x128xf32>
    %83 = math.exp %82 : vector<8x128xf32>
    %cst_27 = arith.constant 1.000000e+00 : f32
    %84 = vector.broadcast %cst_27 : f32 to vector<8x128xf32>
    %85 = arith.addf %84, %83 : vector<8x128xf32>
    %86 = arith.divf %84, %85 : vector<8x128xf32>
    %87 = vector.extract_strided_slice %86 {offsets = [0, 0], sizes = [8, 32], strides = [1, 1]} : vector<8x128xf32> to vector<8x32xf32>
    %88 = vector.extract_strided_slice %86 {offsets = [0, 32], sizes = [8, 32], strides = [1, 1]} : vector<8x128xf32> to vector<8x32xf32>
    %89 = vector.extract_strided_slice %86 {offsets = [0, 64], sizes = [8, 32], strides = [1, 1]} : vector<8x128xf32> to vector<8x32xf32>
    %cst_28 = arith.constant 2.000000e+00 : f32
    %90 = vector.broadcast %cst_28 : f32 to vector<8x32xf32>
    %91 = arith.mulf %90, %89 : vector<8x32xf32>
    %cst_29 = arith.constant 1.000000e+00 : f32
    %92 = vector.broadcast %cst_29 : f32 to vector<8x32xf32>
    %93 = arith.subf %91, %92 : vector<8x32xf32>
    %94 = vector.extract_strided_slice %86 {offsets = [0, 96], sizes = [8, 32], strides = [1, 1]} : vector<8x128xf32> to vector<8x32xf32>
    %95 = arith.mulf %88, %54 : vector<8x32xf32>
    %96 = arith.mulf %87, %93 : vector<8x32xf32>
    %97 = arith.addf %95, %96 : vector<8x32xf32>
    %98 = math.tanh %97 : vector<8x32xf32>
    %99 = arith.mulf %94, %98 : vector<8x32xf32>
    %100 = tpu.concatenate %56, %78 in 1 : vector<8x32xf32>, vector<8x32xf32> -> vector<8x64xf32>
    %cst_30 = arith.constant dense<0.000000e+00> : vector<8x128xf32>
    %101 = tpu.matmul %100, %9, %cst_30 {dimension_numbers = #tpu.dot_dimension_numbers<[1], [0], [0], [1], [0, 0, 1, 1], [], []>} : vector<8x64xf32>, vector<64x128xf32>, vector<8x128xf32> -> vector<8x128xf32>
    %102 = vector.broadcast %10 : vector<1x128xf32> to vector<8x128xf32>
    %103 = arith.addf %101, %102 : vector<8x128xf32>
    %104 = arith.negf %103 : vector<8x128xf32>
    %105 = math.exp %104 : vector<8x128xf32>
    %cst_31 = arith.constant 1.000000e+00 : f32
    %106 = vector.broadcast %cst_31 : f32 to vector<8x128xf32>
    %107 = arith.addf %106, %105 : vector<8x128xf32>
    %108 = arith.divf %106, %107 : vector<8x128xf32>
    %109 = vector.extract_strided_slice %108 {offsets = [0, 0], sizes = [8, 32], strides = [1, 1]} : vector<8x128xf32> to vector<8x32xf32>
    %110 = vector.extract_strided_slice %108 {offsets = [0, 32], sizes = [8, 32], strides = [1, 1]} : vector<8x128xf32> to vector<8x32xf32>
    %111 = vector.extract_strided_slice %108 {offsets = [0, 64], sizes = [8, 32], strides = [1, 1]} : vector<8x128xf32> to vector<8x32xf32>
    %cst_32 = arith.constant 2.000000e+00 : f32
    %112 = vector.broadcast %cst_32 : f32 to vector<8x32xf32>
    %113 = arith.mulf %112, %111 : vector<8x32xf32>
    %cst_33 = arith.constant 1.000000e+00 : f32
    %114 = vector.broadcast %cst_33 : f32 to vector<8x32xf32>
    %115 = arith.subf %113, %114 : vector<8x32xf32>
    %116 = vector.extract_strided_slice %108 {offsets = [0, 96], sizes = [8, 32], strides = [1, 1]} : vector<8x128xf32> to vector<8x32xf32>
    %117 = arith.mulf %110, %76 : vector<8x32xf32>
    %118 = arith.mulf %109, %115 : vector<8x32xf32>
    %119 = arith.addf %117, %118 : vector<8x32xf32>
    %120 = math.tanh %119 : vector<8x32xf32>
    %121 = arith.mulf %116, %120 : vector<8x32xf32>
    %122 = vector.extract_strided_slice %7 {offsets = [24, 0], sizes = [8, 128], strides = [1, 1]} : vector<64x128xf32> to vector<8x128xf32>
    %cst_34 = arith.constant dense<0.000000e+00> : vector<8x128xf32>
    %123 = tpu.matmul %99, %8, %cst_34 {dimension_numbers = #tpu.dot_dimension_numbers<[1], [0], [0], [1], [0, 0, 1, 1], [], []>} : vector<8x32xf32>, vector<32x128xf32>, vector<8x128xf32> -> vector<8x128xf32>
    %124 = arith.addf %122, %123 : vector<8x128xf32>
    %125 = arith.negf %124 : vector<8x128xf32>
    %126 = math.exp %125 : vector<8x128xf32>
    %cst_35 = arith.constant 1.000000e+00 : f32
    %127 = vector.broadcast %cst_35 : f32 to vector<8x128xf32>
    %128 = arith.addf %127, %126 : vector<8x128xf32>
    %129 = arith.divf %127, %128 : vector<8x128xf32>
    %130 = vector.extract_strided_slice %129 {offsets = [0, 0], sizes = [8, 32], strides = [1, 1]} : vector<8x128xf32> to vector<8x32xf32>
    %131 = vector.extract_strided_slice %129 {offsets = [0, 32], sizes = [8, 32], strides = [1, 1]} : vector<8x128xf32> to vector<8x32xf32>
    %132 = vector.extract_strided_slice %129 {offsets = [0, 64], sizes = [8, 32], strides = [1, 1]} : vector<8x128xf32> to vector<8x32xf32>
    %cst_36 = arith.constant 2.000000e+00 : f32
    %133 = vector.broadcast %cst_36 : f32 to vector<8x32xf32>
    %134 = arith.mulf %133, %132 : vector<8x32xf32>
    %cst_37 = arith.constant 1.000000e+00 : f32
    %135 = vector.broadcast %cst_37 : f32 to vector<8x32xf32>
    %136 = arith.subf %134, %135 : vector<8x32xf32>
    %137 = vector.extract_strided_slice %129 {offsets = [0, 96], sizes = [8, 32], strides = [1, 1]} : vector<8x128xf32> to vector<8x32xf32>
    %138 = arith.mulf %131, %97 : vector<8x32xf32>
    %139 = arith.mulf %130, %136 : vector<8x32xf32>
    %140 = arith.addf %138, %139 : vector<8x32xf32>
    %141 = math.tanh %140 : vector<8x32xf32>
    %142 = arith.mulf %137, %141 : vector<8x32xf32>
    %143 = tpu.concatenate %99, %121 in 1 : vector<8x32xf32>, vector<8x32xf32> -> vector<8x64xf32>
    %cst_38 = arith.constant dense<0.000000e+00> : vector<8x128xf32>
    %144 = tpu.matmul %143, %9, %cst_38 {dimension_numbers = #tpu.dot_dimension_numbers<[1], [0], [0], [1], [0, 0, 1, 1], [], []>} : vector<8x64xf32>, vector<64x128xf32>, vector<8x128xf32> -> vector<8x128xf32>
    %145 = vector.broadcast %10 : vector<1x128xf32> to vector<8x128xf32>
    %146 = arith.addf %144, %145 : vector<8x128xf32>
    %147 = arith.negf %146 : vector<8x128xf32>
    %148 = math.exp %147 : vector<8x128xf32>
    %cst_39 = arith.constant 1.000000e+00 : f32
    %149 = vector.broadcast %cst_39 : f32 to vector<8x128xf32>
    %150 = arith.addf %149, %148 : vector<8x128xf32>
    %151 = arith.divf %149, %150 : vector<8x128xf32>
    %152 = vector.extract_strided_slice %151 {offsets = [0, 0], sizes = [8, 32], strides = [1, 1]} : vector<8x128xf32> to vector<8x32xf32>
    %153 = vector.extract_strided_slice %151 {offsets = [0, 32], sizes = [8, 32], strides = [1, 1]} : vector<8x128xf32> to vector<8x32xf32>
    %154 = vector.extract_strided_slice %151 {offsets = [0, 64], sizes = [8, 32], strides = [1, 1]} : vector<8x128xf32> to vector<8x32xf32>
    %cst_40 = arith.constant 2.000000e+00 : f32
    %155 = vector.broadcast %cst_40 : f32 to vector<8x32xf32>
    %156 = arith.mulf %155, %154 : vector<8x32xf32>
    %cst_41 = arith.constant 1.000000e+00 : f32
    %157 = vector.broadcast %cst_41 : f32 to vector<8x32xf32>
    %158 = arith.subf %156, %157 : vector<8x32xf32>
    %159 = vector.extract_strided_slice %151 {offsets = [0, 96], sizes = [8, 32], strides = [1, 1]} : vector<8x128xf32> to vector<8x32xf32>
    %160 = arith.mulf %153, %119 : vector<8x32xf32>
    %161 = arith.mulf %152, %158 : vector<8x32xf32>
    %162 = arith.addf %160, %161 : vector<8x32xf32>
    %163 = math.tanh %162 : vector<8x32xf32>
    %164 = arith.mulf %159, %163 : vector<8x32xf32>
    %165 = vector.extract_strided_slice %7 {offsets = [32, 0], sizes = [8, 128], strides = [1, 1]} : vector<64x128xf32> to vector<8x128xf32>
    %cst_42 = arith.constant dense<0.000000e+00> : vector<8x128xf32>
    %166 = tpu.matmul %142, %8, %cst_42 {dimension_numbers = #tpu.dot_dimension_numbers<[1], [0], [0], [1], [0, 0, 1, 1], [], []>} : vector<8x32xf32>, vector<32x128xf32>, vector<8x128xf32> -> vector<8x128xf32>
    %167 = arith.addf %165, %166 : vector<8x128xf32>
    %168 = arith.negf %167 : vector<8x128xf32>
    %169 = math.exp %168 : vector<8x128xf32>
    %cst_43 = arith.constant 1.000000e+00 : f32
    %170 = vector.broadcast %cst_43 : f32 to vector<8x128xf32>
    %171 = arith.addf %170, %169 : vector<8x128xf32>
    %172 = arith.divf %170, %171 : vector<8x128xf32>
    %173 = vector.extract_strided_slice %172 {offsets = [0, 0], sizes = [8, 32], strides = [1, 1]} : vector<8x128xf32> to vector<8x32xf32>
    %174 = vector.extract_strided_slice %172 {offsets = [0, 32], sizes = [8, 32], strides = [1, 1]} : vector<8x128xf32> to vector<8x32xf32>
    %175 = vector.extract_strided_slice %172 {offsets = [0, 64], sizes = [8, 32], strides = [1, 1]} : vector<8x128xf32> to vector<8x32xf32>
    %cst_44 = arith.constant 2.000000e+00 : f32
    %176 = vector.broadcast %cst_44 : f32 to vector<8x32xf32>
    %177 = arith.mulf %176, %175 : vector<8x32xf32>
    %cst_45 = arith.constant 1.000000e+00 : f32
    %178 = vector.broadcast %cst_45 : f32 to vector<8x32xf32>
    %179 = arith.subf %177, %178 : vector<8x32xf32>
    %180 = vector.extract_strided_slice %172 {offsets = [0, 96], sizes = [8, 32], strides = [1, 1]} : vector<8x128xf32> to vector<8x32xf32>
    %181 = arith.mulf %174, %140 : vector<8x32xf32>
    %182 = arith.mulf %173, %179 : vector<8x32xf32>
    %183 = arith.addf %181, %182 : vector<8x32xf32>
    %184 = math.tanh %183 : vector<8x32xf32>
    %185 = arith.mulf %180, %184 : vector<8x32xf32>
    %186 = tpu.concatenate %142, %164 in 1 : vector<8x32xf32>, vector<8x32xf32> -> vector<8x64xf32>
    %cst_46 = arith.constant dense<0.000000e+00> : vector<8x128xf32>
    %187 = tpu.matmul %186, %9, %cst_46 {dimension_numbers = #tpu.dot_dimension_numbers<[1], [0], [0], [1], [0, 0, 1, 1], [], []>} : vector<8x64xf32>, vector<64x128xf32>, vector<8x128xf32> -> vector<8x128xf32>
    %188 = vector.broadcast %10 : vector<1x128xf32> to vector<8x128xf32>
    %189 = arith.addf %187, %188 : vector<8x128xf32>
    %190 = arith.negf %189 : vector<8x128xf32>
    %191 = math.exp %190 : vector<8x128xf32>
    %cst_47 = arith.constant 1.000000e+00 : f32
    %192 = vector.broadcast %cst_47 : f32 to vector<8x128xf32>
    %193 = arith.addf %192, %191 : vector<8x128xf32>
    %194 = arith.divf %192, %193 : vector<8x128xf32>
    %195 = vector.extract_strided_slice %194 {offsets = [0, 0], sizes = [8, 32], strides = [1, 1]} : vector<8x128xf32> to vector<8x32xf32>
    %196 = vector.extract_strided_slice %194 {offsets = [0, 32], sizes = [8, 32], strides = [1, 1]} : vector<8x128xf32> to vector<8x32xf32>
    %197 = vector.extract_strided_slice %194 {offsets = [0, 64], sizes = [8, 32], strides = [1, 1]} : vector<8x128xf32> to vector<8x32xf32>
    %cst_48 = arith.constant 2.000000e+00 : f32
    %198 = vector.broadcast %cst_48 : f32 to vector<8x32xf32>
    %199 = arith.mulf %198, %197 : vector<8x32xf32>
    %cst_49 = arith.constant 1.000000e+00 : f32
    %200 = vector.broadcast %cst_49 : f32 to vector<8x32xf32>
    %201 = arith.subf %199, %200 : vector<8x32xf32>
    %202 = vector.extract_strided_slice %194 {offsets = [0, 96], sizes = [8, 32], strides = [1, 1]} : vector<8x128xf32> to vector<8x32xf32>
    %203 = arith.mulf %196, %162 : vector<8x32xf32>
    %204 = arith.mulf %195, %201 : vector<8x32xf32>
    %205 = arith.addf %203, %204 : vector<8x32xf32>
    %206 = math.tanh %205 : vector<8x32xf32>
    %207 = arith.mulf %202, %206 : vector<8x32xf32>
    %208 = vector.extract_strided_slice %7 {offsets = [40, 0], sizes = [8, 128], strides = [1, 1]} : vector<64x128xf32> to vector<8x128xf32>
    %cst_50 = arith.constant dense<0.000000e+00> : vector<8x128xf32>
    %209 = tpu.matmul %185, %8, %cst_50 {dimension_numbers = #tpu.dot_dimension_numbers<[1], [0], [0], [1], [0, 0, 1, 1], [], []>} : vector<8x32xf32>, vector<32x128xf32>, vector<8x128xf32> -> vector<8x128xf32>
    %210 = arith.addf %208, %209 : vector<8x128xf32>
    %211 = arith.negf %210 : vector<8x128xf32>
    %212 = math.exp %211 : vector<8x128xf32>
    %cst_51 = arith.constant 1.000000e+00 : f32
    %213 = vector.broadcast %cst_51 : f32 to vector<8x128xf32>
    %214 = arith.addf %213, %212 : vector<8x128xf32>
    %215 = arith.divf %213, %214 : vector<8x128xf32>
    %216 = vector.extract_strided_slice %215 {offsets = [0, 0], sizes = [8, 32], strides = [1, 1]} : vector<8x128xf32> to vector<8x32xf32>
    %217 = vector.extract_strided_slice %215 {offsets = [0, 32], sizes = [8, 32], strides = [1, 1]} : vector<8x128xf32> to vector<8x32xf32>
    %218 = vector.extract_strided_slice %215 {offsets = [0, 64], sizes = [8, 32], strides = [1, 1]} : vector<8x128xf32> to vector<8x32xf32>
    %cst_52 = arith.constant 2.000000e+00 : f32
    %219 = vector.broadcast %cst_52 : f32 to vector<8x32xf32>
    %220 = arith.mulf %219, %218 : vector<8x32xf32>
    %cst_53 = arith.constant 1.000000e+00 : f32
    %221 = vector.broadcast %cst_53 : f32 to vector<8x32xf32>
    %222 = arith.subf %220, %221 : vector<8x32xf32>
    %223 = vector.extract_strided_slice %215 {offsets = [0, 96], sizes = [8, 32], strides = [1, 1]} : vector<8x128xf32> to vector<8x32xf32>
    %224 = arith.mulf %217, %183 : vector<8x32xf32>
    %225 = arith.mulf %216, %222 : vector<8x32xf32>
    %226 = arith.addf %224, %225 : vector<8x32xf32>
    %227 = math.tanh %226 : vector<8x32xf32>
    %228 = arith.mulf %223, %227 : vector<8x32xf32>
    %229 = tpu.concatenate %185, %207 in 1 : vector<8x32xf32>, vector<8x32xf32> -> vector<8x64xf32>
    %cst_54 = arith.constant dense<0.000000e+00> : vector<8x128xf32>
    %230 = tpu.matmul %229, %9, %cst_54 {dimension_numbers = #tpu.dot_dimension_numbers<[1], [0], [0], [1], [0, 0, 1, 1], [], []>} : vector<8x64xf32>, vector<64x128xf32>, vector<8x128xf32> -> vector<8x128xf32>
    %231 = vector.broadcast %10 : vector<1x128xf32> to vector<8x128xf32>
    %232 = arith.addf %230, %231 : vector<8x128xf32>
    %233 = arith.negf %232 : vector<8x128xf32>
    %234 = math.exp %233 : vector<8x128xf32>
    %cst_55 = arith.constant 1.000000e+00 : f32
    %235 = vector.broadcast %cst_55 : f32 to vector<8x128xf32>
    %236 = arith.addf %235, %234 : vector<8x128xf32>
    %237 = arith.divf %235, %236 : vector<8x128xf32>
    %238 = vector.extract_strided_slice %237 {offsets = [0, 0], sizes = [8, 32], strides = [1, 1]} : vector<8x128xf32> to vector<8x32xf32>
    %239 = vector.extract_strided_slice %237 {offsets = [0, 32], sizes = [8, 32], strides = [1, 1]} : vector<8x128xf32> to vector<8x32xf32>
    %240 = vector.extract_strided_slice %237 {offsets = [0, 64], sizes = [8, 32], strides = [1, 1]} : vector<8x128xf32> to vector<8x32xf32>
    %cst_56 = arith.constant 2.000000e+00 : f32
    %241 = vector.broadcast %cst_56 : f32 to vector<8x32xf32>
    %242 = arith.mulf %241, %240 : vector<8x32xf32>
    %cst_57 = arith.constant 1.000000e+00 : f32
    %243 = vector.broadcast %cst_57 : f32 to vector<8x32xf32>
    %244 = arith.subf %242, %243 : vector<8x32xf32>
    %245 = vector.extract_strided_slice %237 {offsets = [0, 96], sizes = [8, 32], strides = [1, 1]} : vector<8x128xf32> to vector<8x32xf32>
    %246 = arith.mulf %239, %205 : vector<8x32xf32>
    %247 = arith.mulf %238, %244 : vector<8x32xf32>
    %248 = arith.addf %246, %247 : vector<8x32xf32>
    %249 = math.tanh %248 : vector<8x32xf32>
    %250 = arith.mulf %245, %249 : vector<8x32xf32>
    %251 = vector.extract_strided_slice %7 {offsets = [48, 0], sizes = [8, 128], strides = [1, 1]} : vector<64x128xf32> to vector<8x128xf32>
    %cst_58 = arith.constant dense<0.000000e+00> : vector<8x128xf32>
    %252 = tpu.matmul %228, %8, %cst_58 {dimension_numbers = #tpu.dot_dimension_numbers<[1], [0], [0], [1], [0, 0, 1, 1], [], []>} : vector<8x32xf32>, vector<32x128xf32>, vector<8x128xf32> -> vector<8x128xf32>
    %253 = arith.addf %251, %252 : vector<8x128xf32>
    %254 = arith.negf %253 : vector<8x128xf32>
    %255 = math.exp %254 : vector<8x128xf32>
    %cst_59 = arith.constant 1.000000e+00 : f32
    %256 = vector.broadcast %cst_59 : f32 to vector<8x128xf32>
    %257 = arith.addf %256, %255 : vector<8x128xf32>
    %258 = arith.divf %256, %257 : vector<8x128xf32>
    %259 = vector.extract_strided_slice %258 {offsets = [0, 0], sizes = [8, 32], strides = [1, 1]} : vector<8x128xf32> to vector<8x32xf32>
    %260 = vector.extract_strided_slice %258 {offsets = [0, 32], sizes = [8, 32], strides = [1, 1]} : vector<8x128xf32> to vector<8x32xf32>
    %261 = vector.extract_strided_slice %258 {offsets = [0, 64], sizes = [8, 32], strides = [1, 1]} : vector<8x128xf32> to vector<8x32xf32>
    %cst_60 = arith.constant 2.000000e+00 : f32
    %262 = vector.broadcast %cst_60 : f32 to vector<8x32xf32>
    %263 = arith.mulf %262, %261 : vector<8x32xf32>
    %cst_61 = arith.constant 1.000000e+00 : f32
    %264 = vector.broadcast %cst_61 : f32 to vector<8x32xf32>
    %265 = arith.subf %263, %264 : vector<8x32xf32>
    %266 = vector.extract_strided_slice %258 {offsets = [0, 96], sizes = [8, 32], strides = [1, 1]} : vector<8x128xf32> to vector<8x32xf32>
    %267 = arith.mulf %260, %226 : vector<8x32xf32>
    %268 = arith.mulf %259, %265 : vector<8x32xf32>
    %269 = arith.addf %267, %268 : vector<8x32xf32>
    %270 = math.tanh %269 : vector<8x32xf32>
    %271 = arith.mulf %266, %270 : vector<8x32xf32>
    %272 = tpu.concatenate %228, %250 in 1 : vector<8x32xf32>, vector<8x32xf32> -> vector<8x64xf32>
    %cst_62 = arith.constant dense<0.000000e+00> : vector<8x128xf32>
    %273 = tpu.matmul %272, %9, %cst_62 {dimension_numbers = #tpu.dot_dimension_numbers<[1], [0], [0], [1], [0, 0, 1, 1], [], []>} : vector<8x64xf32>, vector<64x128xf32>, vector<8x128xf32> -> vector<8x128xf32>
    %274 = vector.broadcast %10 : vector<1x128xf32> to vector<8x128xf32>
    %275 = arith.addf %273, %274 : vector<8x128xf32>
    %276 = arith.negf %275 : vector<8x128xf32>
    %277 = math.exp %276 : vector<8x128xf32>
    %cst_63 = arith.constant 1.000000e+00 : f32
    %278 = vector.broadcast %cst_63 : f32 to vector<8x128xf32>
    %279 = arith.addf %278, %277 : vector<8x128xf32>
    %280 = arith.divf %278, %279 : vector<8x128xf32>
    %281 = vector.extract_strided_slice %280 {offsets = [0, 0], sizes = [8, 32], strides = [1, 1]} : vector<8x128xf32> to vector<8x32xf32>
    %282 = vector.extract_strided_slice %280 {offsets = [0, 32], sizes = [8, 32], strides = [1, 1]} : vector<8x128xf32> to vector<8x32xf32>
    %283 = vector.extract_strided_slice %280 {offsets = [0, 64], sizes = [8, 32], strides = [1, 1]} : vector<8x128xf32> to vector<8x32xf32>
    %cst_64 = arith.constant 2.000000e+00 : f32
    %284 = vector.broadcast %cst_64 : f32 to vector<8x32xf32>
    %285 = arith.mulf %284, %283 : vector<8x32xf32>
    %cst_65 = arith.constant 1.000000e+00 : f32
    %286 = vector.broadcast %cst_65 : f32 to vector<8x32xf32>
    %287 = arith.subf %285, %286 : vector<8x32xf32>
    %288 = vector.extract_strided_slice %280 {offsets = [0, 96], sizes = [8, 32], strides = [1, 1]} : vector<8x128xf32> to vector<8x32xf32>
    %289 = arith.mulf %282, %248 : vector<8x32xf32>
    %290 = arith.mulf %281, %287 : vector<8x32xf32>
    %291 = arith.addf %289, %290 : vector<8x32xf32>
    %292 = math.tanh %291 : vector<8x32xf32>
    %293 = arith.mulf %288, %292 : vector<8x32xf32>
    %294 = vector.extract_strided_slice %7 {offsets = [56, 0], sizes = [8, 128], strides = [1, 1]} : vector<64x128xf32> to vector<8x128xf32>
    %cst_66 = arith.constant dense<0.000000e+00> : vector<8x128xf32>
    %295 = tpu.matmul %271, %8, %cst_66 {dimension_numbers = #tpu.dot_dimension_numbers<[1], [0], [0], [1], [0, 0, 1, 1], [], []>} : vector<8x32xf32>, vector<32x128xf32>, vector<8x128xf32> -> vector<8x128xf32>
    %296 = arith.addf %294, %295 : vector<8x128xf32>
    %297 = arith.negf %296 : vector<8x128xf32>
    %298 = math.exp %297 : vector<8x128xf32>
    %cst_67 = arith.constant 1.000000e+00 : f32
    %299 = vector.broadcast %cst_67 : f32 to vector<8x128xf32>
    %300 = arith.addf %299, %298 : vector<8x128xf32>
    %301 = arith.divf %299, %300 : vector<8x128xf32>
    %302 = vector.extract_strided_slice %301 {offsets = [0, 0], sizes = [8, 32], strides = [1, 1]} : vector<8x128xf32> to vector<8x32xf32>
    %303 = vector.extract_strided_slice %301 {offsets = [0, 32], sizes = [8, 32], strides = [1, 1]} : vector<8x128xf32> to vector<8x32xf32>
    %304 = vector.extract_strided_slice %301 {offsets = [0, 64], sizes = [8, 32], strides = [1, 1]} : vector<8x128xf32> to vector<8x32xf32>
    %cst_68 = arith.constant 2.000000e+00 : f32
    %305 = vector.broadcast %cst_68 : f32 to vector<8x32xf32>
    %306 = arith.mulf %305, %304 : vector<8x32xf32>
    %cst_69 = arith.constant 1.000000e+00 : f32
    %307 = vector.broadcast %cst_69 : f32 to vector<8x32xf32>
    %308 = arith.subf %306, %307 : vector<8x32xf32>
    %309 = vector.extract_strided_slice %301 {offsets = [0, 96], sizes = [8, 32], strides = [1, 1]} : vector<8x128xf32> to vector<8x32xf32>
    %310 = arith.mulf %303, %269 : vector<8x32xf32>
    %311 = arith.mulf %302, %308 : vector<8x32xf32>
    %312 = arith.addf %310, %311 : vector<8x32xf32>
    %313 = math.tanh %312 : vector<8x32xf32>
    %314 = arith.mulf %309, %313 : vector<8x32xf32>
    %315 = tpu.concatenate %271, %293 in 1 : vector<8x32xf32>, vector<8x32xf32> -> vector<8x64xf32>
    %cst_70 = arith.constant dense<0.000000e+00> : vector<8x128xf32>
    %316 = tpu.matmul %315, %9, %cst_70 {dimension_numbers = #tpu.dot_dimension_numbers<[1], [0], [0], [1], [0, 0, 1, 1], [], []>} : vector<8x64xf32>, vector<64x128xf32>, vector<8x128xf32> -> vector<8x128xf32>
    %317 = vector.broadcast %10 : vector<1x128xf32> to vector<8x128xf32>
    %318 = arith.addf %316, %317 : vector<8x128xf32>
    %319 = arith.negf %318 : vector<8x128xf32>
    %320 = math.exp %319 : vector<8x128xf32>
    %cst_71 = arith.constant 1.000000e+00 : f32
    %321 = vector.broadcast %cst_71 : f32 to vector<8x128xf32>
    %322 = arith.addf %321, %320 : vector<8x128xf32>
    %323 = arith.divf %321, %322 : vector<8x128xf32>
    %324 = vector.extract_strided_slice %323 {offsets = [0, 0], sizes = [8, 32], strides = [1, 1]} : vector<8x128xf32> to vector<8x32xf32>
    %325 = vector.extract_strided_slice %323 {offsets = [0, 32], sizes = [8, 32], strides = [1, 1]} : vector<8x128xf32> to vector<8x32xf32>
    %326 = vector.extract_strided_slice %323 {offsets = [0, 64], sizes = [8, 32], strides = [1, 1]} : vector<8x128xf32> to vector<8x32xf32>
    %cst_72 = arith.constant 2.000000e+00 : f32
    %327 = vector.broadcast %cst_72 : f32 to vector<8x32xf32>
    %328 = arith.mulf %327, %326 : vector<8x32xf32>
    %cst_73 = arith.constant 1.000000e+00 : f32
    %329 = vector.broadcast %cst_73 : f32 to vector<8x32xf32>
    %330 = arith.subf %328, %329 : vector<8x32xf32>
    %331 = vector.extract_strided_slice %323 {offsets = [0, 96], sizes = [8, 32], strides = [1, 1]} : vector<8x128xf32> to vector<8x32xf32>
    %332 = arith.mulf %325, %291 : vector<8x32xf32>
    %333 = arith.mulf %324, %330 : vector<8x32xf32>
    %334 = arith.addf %332, %333 : vector<8x32xf32>
    %335 = math.tanh %334 : vector<8x32xf32>
    %336 = arith.mulf %331, %335 : vector<8x32xf32>
    %337 = tpu.concatenate %314, %336 in 1 : vector<8x32xf32>, vector<8x32xf32> -> vector<8x64xf32>
    %cst_74 = arith.constant dense<0.000000e+00> : vector<8x128xf32>
    %338 = tpu.matmul %337, %9, %cst_74 {dimension_numbers = #tpu.dot_dimension_numbers<[1], [0], [0], [1], [0, 0, 1, 1], [], []>} : vector<8x64xf32>, vector<64x128xf32>, vector<8x128xf32> -> vector<8x128xf32>
    %339 = vector.broadcast %10 : vector<1x128xf32> to vector<8x128xf32>
    %340 = arith.addf %338, %339 : vector<8x128xf32>
    %341 = arith.negf %340 : vector<8x128xf32>
    %342 = math.exp %341 : vector<8x128xf32>
    %cst_75 = arith.constant 1.000000e+00 : f32
    %343 = vector.broadcast %cst_75 : f32 to vector<8x128xf32>
    %344 = arith.addf %343, %342 : vector<8x128xf32>
    %345 = arith.divf %343, %344 : vector<8x128xf32>
    %346 = vector.extract_strided_slice %345 {offsets = [0, 0], sizes = [8, 32], strides = [1, 1]} : vector<8x128xf32> to vector<8x32xf32>
    %347 = vector.extract_strided_slice %345 {offsets = [0, 32], sizes = [8, 32], strides = [1, 1]} : vector<8x128xf32> to vector<8x32xf32>
    %348 = vector.extract_strided_slice %345 {offsets = [0, 64], sizes = [8, 32], strides = [1, 1]} : vector<8x128xf32> to vector<8x32xf32>
    %cst_76 = arith.constant 2.000000e+00 : f32
    %349 = vector.broadcast %cst_76 : f32 to vector<8x32xf32>
    %350 = arith.mulf %349, %348 : vector<8x32xf32>
    %cst_77 = arith.constant 1.000000e+00 : f32
    %351 = vector.broadcast %cst_77 : f32 to vector<8x32xf32>
    %352 = arith.subf %350, %351 : vector<8x32xf32>
    %353 = vector.extract_strided_slice %345 {offsets = [0, 96], sizes = [8, 32], strides = [1, 1]} : vector<8x128xf32> to vector<8x32xf32>
    %354 = arith.mulf %347, %334 : vector<8x32xf32>
    %355 = arith.mulf %346, %352 : vector<8x32xf32>
    %356 = arith.addf %354, %355 : vector<8x32xf32>
    %357 = math.tanh %356 : vector<8x32xf32>
    %358 = arith.mulf %353, %357 : vector<8x32xf32>
    %c0_78 = arith.constant 0 : index
    %c0_79 = arith.constant 0 : index
    %359 = vector.load %arg7[%c0_78, %c0_79] : memref<32x64xf32, #tpu.memory_space<vmem>>, vector<32x64xf32>
    %cst_80 = arith.constant dense<0.000000e+00> : vector<8x64xf32>
    %360 = tpu.matmul %358, %359, %cst_80 {dimension_numbers = #tpu.dot_dimension_numbers<[1], [0], [0], [1], [0, 0, 1, 1], [], []>} : vector<8x32xf32>, vector<32x64xf32>, vector<8x64xf32> -> vector<8x64xf32>
    %c0_81 = arith.constant 0 : index
    %c0_82 = arith.constant 0 : index
    %361 = vector.load %arg8[%c0_81, %c0_82] : memref<1x64xf32, #tpu.memory_space<vmem>>, vector<1x64xf32>
    %362 = vector.broadcast %361 : vector<1x64xf32> to vector<8x64xf32>
    %363 = arith.addf %360, %362 : vector<8x64xf32>
    %cst_83 = arith.constant 0.000000e+00 : f32
    %364 = vector.broadcast %cst_83 : f32 to vector<8x64xf32>
    %365 = arith.cmpf oge, %363, %364 : vector<8x64xf32>
    %cst_84 = arith.constant 0.00999999977 : f32
    %366 = vector.broadcast %cst_84 : f32 to vector<8x64xf32>
    %367 = arith.mulf %366, %363 : vector<8x64xf32>
    %368 = arith.select %365, %363, %367 : vector<8x64xi1>, vector<8x64xf32>
    %c0_85 = arith.constant 0 : index
    %c0_86 = arith.constant 0 : index
    %369 = vector.load %arg9[%c0_85, %c0_86] : memref<64x32xf32, #tpu.memory_space<vmem>>, vector<64x32xf32>
    %cst_87 = arith.constant dense<0.000000e+00> : vector<8x32xf32>
    %370 = tpu.matmul %368, %369, %cst_87 {dimension_numbers = #tpu.dot_dimension_numbers<[1], [0], [0], [1], [0, 0, 1, 1], [], []>} : vector<8x64xf32>, vector<64x32xf32>, vector<8x32xf32> -> vector<8x32xf32>
    %c0_88 = arith.constant 0 : index
    %c0_89 = arith.constant 0 : index
    %371 = vector.load %arg10[%c0_88, %c0_89] : memref<1x32xf32, #tpu.memory_space<vmem>>, vector<1x32xf32>
    %372 = vector.broadcast %371 : vector<1x32xf32> to vector<8x32xf32>
    %373 = arith.addf %370, %372 : vector<8x32xf32>
    %cst_90 = arith.constant 0.000000e+00 : f32
    %374 = vector.broadcast %cst_90 : f32 to vector<8x32xf32>
    %375 = arith.cmpf oge, %373, %374 : vector<8x32xf32>
    %cst_91 = arith.constant 0.00999999977 : f32
    %376 = vector.broadcast %cst_91 : f32 to vector<8x32xf32>
    %377 = arith.mulf %376, %373 : vector<8x32xf32>
    %378 = arith.select %375, %373, %377 : vector<8x32xi1>, vector<8x32xf32>
    %c0_92 = arith.constant 0 : index
    %c0_93 = arith.constant 0 : index
    %379 = vector.load %arg11[%c0_92, %c0_93] : memref<32x4xf32, #tpu.memory_space<vmem>>, vector<32x4xf32>
    %cst_94 = arith.constant dense<0.000000e+00> : vector<8x4xf32>
    %380 = tpu.matmul %378, %379, %cst_94 {dimension_numbers = #tpu.dot_dimension_numbers<[1], [0], [0], [1], [0, 0, 1, 1], [], []>} : vector<8x32xf32>, vector<32x4xf32>, vector<8x4xf32> -> vector<8x4xf32>
    %c0_95 = arith.constant 0 : index
    %c0_96 = arith.constant 0 : index
    %381 = vector.load %arg12[%c0_95, %c0_96] : memref<1x4xf32, #tpu.memory_space<vmem>>, vector<1x4xf32>
    %382 = vector.broadcast %381 : vector<1x4xf32> to vector<8x4xf32>
    %383 = arith.addf %380, %382 : vector<8x4xf32>
    %c0_97 = arith.constant 0 : index
    %c0_98 = arith.constant 0 : index
    %384 = vector.load %arg13[%c0_97, %c0_98] : memref<8x4xf32, #tpu.memory_space<vmem>>, vector<8x4xf32>
    tpu.vector_store %arg13[%c0_97, %c0_98], %383 {strides = array<i32>} : memref<8x4xf32, #tpu.memory_space<vmem>>, vector<8x4xf32>,
    return
  }
  func.func @transform_0(%arg0: i32) -> (i32, i32) {
    %c0_i32 = arith.constant 0 : i32
    %c0_i32_0 = arith.constant 0 : i32
    %c0_i32_1 = arith.constant 0 : i32
    return %c0_i32, %c0_i32_0 : i32, i32
  }
  func.func @transform_1(%arg0: i32) -> (i32, i32) {
    %c0_i32 = arith.constant 0 : i32
    %c0_i32_0 = arith.constant 0 : i32
    %c0_i32_1 = arith.constant 0 : i32
    return %c0_i32, %c0_i32_0 : i32, i32
  }
  func.func @transform_2(%arg0: i32) -> (i32, i32) {
    %c0_i32 = arith.constant 0 : i32
    %c0_i32_0 = arith.constant 0 : i32
    %c0_i32_1 = arith.constant 0 : i32
    return %c0_i32, %c0_i32_0 : i32, i32
  }
  func.func @transform_3(%arg0: i32) -> (i32, i32) {
    %c0_i32 = arith.constant 0 : i32
    %c0_i32_0 = arith.constant 0 : i32
    %c0_i32_1 = arith.constant 0 : i32
    return %c0_i32, %c0_i32_0 : i32, i32
  }
  func.func @transform_4(%arg0: i32) -> (i32, i32) {
    %c0_i32 = arith.constant 0 : i32
    %c0_i32_0 = arith.constant 0 : i32
    %c0_i32_1 = arith.constant 0 : i32
    return %c0_i32, %c0_i32_0 : i32, i32
  }
  func.func @transform_5(%arg0: i32) -> (i32, i32) {
    %c0_i32 = arith.constant 0 : i32
    %c0_i32_0 = arith.constant 0 : i32
    %c0_i32_1 = arith.constant 0 : i32
    return %c0_i32, %c0_i32_0 : i32, i32
  }
  func.func @transform_6(%arg0: i32) -> (i32, i32) {
    %c0_i32 = arith.constant 0 : i32
    %c0_i32_0 = arith.constant 0 : i32
    %c0_i32_1 = arith.constant 0 : i32
    return %c0_i32, %c0_i32_0 : i32, i32
  }
  func.func @transform_7(%arg0: i32) -> (i32, i32) {
    %c0_i32 = arith.constant 0 : i32
    %c0_i32_0 = arith.constant 0 : i32
    %c0_i32_1 = arith.constant 0 : i32
    return %c0_i32, %c0_i32_0 : i32, i32
  }
  func.func @transform_8(%arg0: i32) -> (i32, i32) {
    %c0_i32 = arith.constant 0 : i32
    %c0_i32_0 = arith.constant 0 : i32
    %c0_i32_1 = arith.constant 0 : i32
    return %c0_i32, %c0_i32_0 : i32, i32
  }
  func.func @transform_9(%arg0: i32) -> (i32, i32) {
    %c0_i32 = arith.constant 0 : i32
    %c0_i32_0 = arith.constant 0 : i32
    %c0_i32_1 = arith.constant 0 : i32
    return %c0_i32, %c0_i32_0 : i32, i32
  }
  func.func @transform_10(%arg0: i32) -> (i32, i32) {
    %c0_i32 = arith.constant 0 : i32
    %c0_i32_0 = arith.constant 0 : i32
    %c0_i32_1 = arith.constant 0 : i32
    return %c0_i32, %c0_i32_0 : i32, i32
  }
  func.func @transform_11(%arg0: i32) -> (i32, i32) {
    %c0_i32 = arith.constant 0 : i32
    %c0_i32_0 = arith.constant 0 : i32
    %c0_i32_1 = arith.constant 0 : i32
    return %c0_i32, %c0_i32_0 : i32, i32
  }
  func.func @transform_12(%arg0: i32) -> (i32, i32) {
    %c0_i32 = arith.constant 0 : i32
    %c0_i32_0 = arith.constant 0 : i32
    %c0_i32_1 = arith.constant 0 : i32
    return %c0_i32, %c0_i32_0 : i32, i32
  }
}

</mosaic_0001>

<bundles_post_ra>
// kernel: lstm_model_forward.1
= control target key start
LH: loop header
LB: loop body
LE: loop exit
PB: predicated region body
PF: predicated region fallthrough
CT: control target
= control target key end

     0   :  { %v1448_v2 = vmov 0   ;;  %v1449_v6 = vmov 0.0   ;;  %s1450_s16 = smov 64   ;;  %s1451_s17 = smov 32   ;;  %vm126_vm4 = vcmask 261120   ;;  %vm258_vm5 = vcmask 523264   ;;  %s1953_s2 = inlined_call_operand.vmem [shape: f32[32,128], index: 2, kind: input, shape index: {}]   ;;  %s1954_s0 = inlined_call_operand.vmem [shape: f32[64,1], index: 0, kind: input, shape index: {}]   ;;  %s1955_s1 = inlined_call_operand.vmem [shape: f32[1,128], index: 1, kind: input, shape index: {}]   ;;  %s1956_s3 = inlined_call_operand.vmem [shape: f32[1,128], index: 3, kind: input, shape index: {}]   ;;  %s1957_s4 = inlined_call_operand.vmem [shape: f32[64,128], index: 4, kind: input, shape index: {}]   ;;  %s1958_s5 = inlined_call_operand.vmem [shape: f32[1,128], index: 5, kind: input, shape index: {}]   ;;  %s1959_s7 = inlined_call_operand.vmem [shape: f32[1,64], index: 7, kind: input, shape index: {}]   ;;  %s1960_s6 = inlined_call_operand.vmem [shape: f32[32,64], index: 6, kind: input, shape index: {}]   ;;  %s1961_s8 = inlined_call_operand.vmem [shape: f32[64,32], index: 8, kind: input, shape index: {}]   ;;  %s1962_s9 = inlined_call_operand.vmem [shape: f32[1,32], index: 9, kind: input, shape index: {}]   ;;  %s1963_s10 = inlined_call_operand.vmem [shape: f32[32,4], index: 10, kind: input, shape index: {}]   ;;  %s1964_s11 = inlined_call_operand.vmem [shape: f32[1,4], index: 11, kind: input, shape index: {}]   ;;  %s1965_s12 = inlined_call_operand.vmem [shape: f32[8,4], index: 12, kind: output, shape index: {}]  }
   0x1   :  { %v1520_v0 = vld [vmem:[%s1953_s2 + $0x18] sm:$0xff]  ;;  %v1525_v1 = vld [vmem:[%s1953_s2 + $0x10] sm:$0xff]  ;;  %1341 = vset.pattern.permute.xlu0 %v1448_v2  ;;  %1342 = vset.pattern.permute.xlu2 %v1448_v2  ;;  %v41_v3 = vld [vmem:[%s1954_s0] sm:$0xff] }
   0x2   :  { %142 = vmatpush.msra.mxu3 %v1520_v0  ;;  %206 = vmatpush.msra.mxu1 %v1520_v0  ;;  %v1535_v4 = vld [vmem:[%s1953_s2 + $0x8] sm:$0xff]  ;;  %v1542_v5 = vld [vmem:[%s1953_s2] sm:$0xff]  ;;  %v1577_v35 = vld [vmem:[%s1957_s4 + $0x38] sm:$0xff] }
   0x3   :  { %52 = vperm.xlu0 %1341, %v41_v3   ;;  %v1559_v7 = vld [vmem:[%s1955_s1] ss:$0 sm:$0xff]  ;;  %v1582_v36 = vld [vmem:[%s1957_s4 + $0x30] sm:$0xff]  ;;  %270 = vmatpush.msra.mxu2 %v1577_v35  ;;  %v1589_v37 = vld [vmem:[%s1957_s4 + $0x28] sm:$0xff] }
   0x4   :  { %143 = vmatpush.msra.mxu3 %v1525_v1  ;;  %207 = vmatpush.msra.mxu1 %v1525_v1  ;;  %v1565_v10 = vld [vmem:[%s1956_s3] ss:$0 sm:$0xff]  ;;  %v1605_v39 = vld [vmem:[%s1957_s4 + $0x18] sm:$0xff]  ;;  %v1613_v40 = vld [vmem:[%s1957_s4 + $0x10] sm:$0xff] }
   0x5   :  { %401 = vmatpush.msra.mxu0 %v1577_v35  ;;  %271 = vmatpush.msra.mxu2 %v1582_v36  ;;  %v1597_v38 = vld [vmem:[%s1957_s4 + $0x20] sm:$0xff]  ;;  %v1621_v41 = vld [vmem:[%s1957_s4 + $0x8] sm:$0xff] }
   0x6   :  { %144 = vmatpush.msra.mxu3 %v1535_v4  ;;  %208 = vmatpush.msra.mxu1 %v1535_v4  ;;  %v1634_v44 = vld [vmem:[%s1957_s4] sm:$0xff]  ;;  %v42_v45 = vld [vmem:[%s1954_s0 + $0x8] sm:$0xff] }
   0x7   :  { %402 = vmatpush.msra.mxu0 %v1582_v36  ;;  %272 = vmatpush.msra.mxu2 %v1589_v37  ;;  %v1670_v54 = vld [vmem:[%s1958_s5] ss:$0 sm:$0xff] }
   0x8   :  { %145 = vmatpush.msra.mxu3 %v1542_v5  ;;  %209 = vmatpush.msra.mxu1 %v1542_v5 }
   0x9   :  { %146 = vmatmul.f32.vlgmr.msra.gmra.mxu3 %v1449_v6  ;;  %403 = vmatpush.msra.mxu0 %v1589_v37 }
   0xa   :  { %468 = vmatpush.msrb.mxu1 %v1520_v0  ;;  %337 = vmatpush.msrb.mxu3 %v1520_v0 }
   0xb   :  { %273 = vmatpush.msra.mxu2 %v1597_v38  ;;  %404 = vmatpush.msra.mxu0 %v1597_v38 }
   0xc   :  { %469 = vmatpush.msrb.mxu1 %v1525_v1  ;;  %338 = vmatpush.msrb.mxu3 %v1525_v1 }
   0xd   :  { %274 = vmatpush.msra.mxu2 %v1605_v39  ;;  %405 = vmatpush.msra.mxu0 %v1605_v39 }
   0xe   :  { %470 = vmatpush.msrb.mxu1 %v1535_v4  ;;  %339 = vmatpush.msrb.mxu3 %v1535_v4 }
   0xf   :  { %275 = vmatpush.msra.mxu2 %v1613_v40  ;;  %406 = vmatpush.msra.mxu0 %v1613_v40 }
  0x10   :  { %471 = vmatpush.msrb.mxu1 %v1542_v5  ;;  %340 = vmatpush.msrb.mxu3 %v1542_v5 }
  0x11   :  { %276 = vmatpush.msra.mxu2 %v1621_v41  ;;  %407 = vmatpush.msra.mxu0 %v1621_v41 }
  0x12   :  { %532 = vmatpush.msra.mxu3 %v1577_v35 }
  0x13   :  { %277 = vmatpush.msra.mxu2 %v1634_v44  ;;  %408 = vmatpush.msra.mxu0 %v1634_v44 }
  0x14   :  { %533 = vmatpush.msra.mxu3 %v1582_v36 }
  0x15   :  { %663 = vmatpush.msrb.mxu2 %v1577_v35  ;;  %730 = vmatpush.msrb.mxu0 %v1520_v0 }
  0x16   :  { %534 = vmatpush.msra.mxu3 %v1589_v37 }
  0x17   :  { %664 = vmatpush.msrb.mxu2 %v1582_v36  ;;  %731 = vmatpush.msrb.mxu0 %v1525_v1 }
  0x18   :  { %535 = vmatpush.msra.mxu3 %v1597_v38 }
  0x19   :  { %665 = vmatpush.msrb.mxu2 %v1589_v37  ;;  %732 = vmatpush.msrb.mxu0 %v1535_v4 }
  0x1a   :  { %536 = vmatpush.msra.mxu3 %v1605_v39 }
  0x1b   :  { %666 = vmatpush.msrb.mxu2 %v1597_v38  ;;  %733 = vmatpush.msrb.mxu0 %v1542_v5 }
  0x1c   :  { %537 = vmatpush.msra.mxu3 %v1613_v40 }
  0x1d   :  { %667 = vmatpush.msrb.mxu2 %v1605_v39 }
  0x1e   :  { %538 = vmatpush.msra.mxu3 %v1621_v41 }
  0x1f   :  { %668 = vmatpush.msrb.mxu2 %v1613_v40 }
  0x20   :  { %539 = vmatpush.msra.mxu3 %v1634_v44 }
  0x21   :  { %669 = vmatpush.msrb.mxu2 %v1621_v41 }
  0x23   :  { %670 = vmatpush.msrb.mxu2 %v1634_v44 }
  0x75   :  { %v53_v8 = vpop.permute.xlu0 %52 }
  0x76   :  { %v93_v9 = vmul.f32 %v1559_v7, %v53_v8 }
  0x78   :  { %v105_v11 = vadd.f32 %v1565_v10, %v93_v9 }
  0x8c   :  { %v147_v12 = vpop.f32.mrf.mxu3 }
  0x8d   :  { %v150_v13 = vadd.f32 %v147_v12, %v105_v11 }
  0x8f   :  { %v1287_v14 = vmul.f32 -1.442695, %v150_v13 }
  0x91   :  { %1349 = vpow2.f32 %v1287_v14 }
  0x97   :  { %v1350_v15 = vpop.eup %1349 }
  0x98   :  { %v154_v16 = vadd.f32 1.0, %v1350_v15 }
  0x9a   :  { %1351 = vrcp.f32 %v154_v16  ;;  %v166_v20 = vand.u32 2147483648, %v154_v16  ;;  %v164_v22 = vand.u32 2147483647, %v154_v16  ;;  %vm160_vm1 = vweird.f32 %v154_v16 }
  0x9c   :  { %v167_v24 = vor.u32 1.1754944e-38, %v166_v20  ;;  %vm165_vm3 = vcmp.eq.f32.partialorder %v164_v22, 8.507059e+37 }
  0xa0   :  { %v1352_v17 = vpop.eup %1351 }
  0xa1   :  { %v156_v18 = vmul.f32 %v1352_v17, %v154_v16  ;;  %vm161_vm0 = vweird.f32 %v1352_v17 }
  0xa2   :  { %vm162_vm2 = vmor %vm160_vm1, %vm161_vm0 }
  0xa3   :  { %v157_v19 = vsub.f32 1.0, %v156_v18 }
  0xa5   :  { %v158_v21 = vmul.f32 %v1352_v17, %v157_v19 }
  0xa7   :  { %v159_v23 = vadd.f32 %v1352_v17, %v158_v21 }
  0xa9   :  { %v163_v25 = vsel %vm162_vm2, %v1352_v17, %v159_v23 }
  0xaa   :  { %v168_v26 = vsel %vm165_vm3, %v167_v24, %v163_v25 }
  0xab   :  { %v170_v27 = vmul.f32 2.0, %v168_v26  ;;  %v172_v31 = vmul.f32 0.0, %v168_v26 }
  0xad   :  { %v1288_v28 = vadd.f32 -1.0, %v170_v27 }
  0xaf   :  { %174 = vrot.lane.b32.xlu0 %v1288_v28, %s1450_s16 }
 0x121   :  { %v175_v29 = vpop.permute.xlu0 %174 }
 0x122   :  { %v177_v30 = vmul.f32 %v175_v29, %v168_v26 }
 0x124   :  { %179 = vrot.lane.b32.xlu1 %v177_v30, %s1451_s17 }
 0x196   :  { %v180_v32 = vpop.permute.xlu1 %179 }
 0x197   :  { %v1570_v33 = vadd.f32 %v180_v32, %v172_v31 }
 0x199   :  { %1353 = vtanh.f32 %v1570_v33 }
 0x19f   :  { %v1354_v34 = vpop.eup %1353 }
 0x1a0   :  { %185 = vrot.lane.b32.xlu1 %v1354_v34, %s1450_s16 }
 0x212   :  { %v186_v42 = vpop.permute.xlu1 %185 }
 0x213   :  { %v188_v43 = vmul.f32 %v186_v42, %v168_v26 }
 0x215   :  { %190 = vrot.lane.b32.xlu2 %v188_v43, %s1451_s17 }
 0x21d   :  { %57 = vperm.xlu2 %1342, %v42_v45  }
 0x26f   :  { %v191_v46 = vpop.permute.xlu2 %190 }
 0x270   :  { %1289 = vmatmul.msk.f32.vlgmr.msra.gmra.mxu1 %vm126_vm4, %v191_v46  ;;  %v254_v47 = vsel %vm126_vm4, %v191_v46, 0.0 }
 0x271   :  { %1292 = vmatmul.msk.f32.vlgmr.msra.gmra.mxu2 %vm258_vm5, %v254_v47  ;;  %599 = vmatpush.msra.mxu1 %v1520_v0 }
 0x272   :  { %992 = vmatpush.msra.mxu2 %v1520_v0 }
 0x273   :  { %600 = vmatpush.msra.mxu1 %v1525_v1 }
 0x274   :  { %993 = vmatpush.msra.mxu2 %v1525_v1 }
 0x275   :  { %601 = vmatpush.msra.mxu1 %v1535_v4 }
 0x276   :  { %994 = vmatpush.msra.mxu2 %v1535_v4 }
 0x277   :  { %602 = vmatpush.msra.mxu1 %v1542_v5  ;;  %v58_v48 = vpop.permute.xlu2 %57 }
 0x278   :  { %995 = vmatpush.msra.mxu2 %v1542_v5  ;;  %v94_v49 = vmul.f32 %v1559_v7, %v58_v48 }
 0x27a   :  { %v106_v50 = vadd.f32 %v1565_v10, %v94_v49 }
 0x2ed   :  { %v211_v51 = vpop.f32.mrf.mxu1 }
 0x2ee   :  { %v214_v52 = vadd.f32 %v211_v51, %v106_v50 }
 0x2f0   :  { %v1290_v53 = vmul.f32 -1.442695, %v214_v52 }
 0x2f2   :  { %1355 = vpow2.f32 %v1290_v53 }
 0x2f4   :  { %v279_v55 = vpop.f32.mrf.mxu2 }
 0x2f5   :  { %v280_v56 = vadd.f32 %v1670_v54, %v279_v55 }
 0x2f7   :  { %v1293_v57 = vmul.f32 -1.442695, %v280_v56 }
 0x2f8   :  { %v1356_v58 = vpop.eup %1355 }
 0x2f9   :  { %v218_v59 = vadd.f32 1.0, %v1356_v58  ;;  %1357 = vpow2.f32 %v1293_v57 }
 0x2fb   :  { %1359 = vrcp.f32 %v218_v59  ;;  %v230_v3 = vand.u32 2147483648, %v218_v59  ;;  %v228_v8 = vand.u32 2147483647, %v218_v59  ;;  %vm224_vm7 = vweird.f32 %v218_v59 }
 0x2fd   :  { %v231_v13 = vor.u32 1.1754944e-38, %v230_v3  ;;  %vm229_vm9 = vcmp.eq.f32.partialorder %v228_v8, 8.507059e+37 }
 0x2ff   :  { %v1358_v60 = vpop.eup %1357 }
 0x300   :  { %v285_v61 = vadd.f32 1.0, %v1358_v60 }
 0x301   :  { %v1360_v62 = vpop.eup %1359 }
 0x302   :  { %v220_v63 = vmul.f32 %v1360_v62, %v218_v59  ;;  %1361 = vrcp.f32 %v285_v61  ;;  %vm225_vm6 = vweird.f32 %v1360_v62  ;;  %v297_v18 = vand.u32 2147483648, %v285_v61 }
 0x303   :  { %vm226_vm8 = vmor %vm224_vm7, %vm225_vm6  ;;  %v295_v20 = vand.u32 2147483647, %v285_v61  ;;  %vm291_vm11 = vweird.f32 %v285_v61 }
 0x304   :  { %v221_v2 = vsub.f32 1.0, %v220_v63  ;;  %v298_v23 = vor.u32 1.1754944e-38, %v297_v18 }
 0x305   :  { %vm296_vm13 = vcmp.eq.f32.partialorder %v295_v20, 8.507059e+37 }
 0x306   :  { %v222_v6 = vmul.f32 %v1360_v62, %v221_v2 }
 0x308   :  { %v1362_v9 = vpop.eup %1361  ;;  %v223_v11 = vadd.f32 %v1360_v62, %v222_v6 }
 0x309   :  { %v287_v12 = vmul.f32 %v1362_v9, %v285_v61  ;;  %vm292_vm10 = vweird.f32 %v1362_v9 }
 0x30a   :  { %v227_v14 = vsel %vm226_vm8, %v1360_v62, %v223_v11  ;;  %vm293_vm12 = vmor %vm291_vm11, %vm292_vm10 }
 0x30b   :  { %v288_v15 = vsub.f32 1.0, %v287_v12  ;;  %v232_v16 = vsel %vm229_vm9, %v231_v13, %v227_v14 }
 0x30c   :  { %v234_v17 = vmul.f32 2.0, %v232_v16  ;;  %v236_v32 = vmul.f32 %v232_v16, %v1570_v33  ;;  %v43_v33 = vld [vmem:[%s1954_s0 + $0x10] sm:$0xff] }
 0x30d   :  { %v289_v19 = vmul.f32 %v1362_v9, %v288_v15 }
 0x30e   :  { %v1291_v21 = vadd.f32 -1.0, %v234_v17 }
 0x30f   :  { %v290_v22 = vadd.f32 %v1362_v9, %v289_v19 }
 0x310   :  { %238 = vrot.lane.b32.xlu0 %v1291_v21, %s1450_s16 }
 0x311   :  { %v294_v24 = vsel %vm293_vm12, %v1362_v9, %v290_v22 }
 0x312   :  { %v299_v25 = vsel %vm296_vm13, %v298_v23, %v294_v24 }
 0x313   :  { %v301_v26 = vmul.f32 2.0, %v299_v25  ;;  %v303_v45 = vmul.f32 0.0, %v299_v25 }
 0x315   :  { %v1294_v27 = vadd.f32 -1.0, %v301_v26 }
 0x317   :  { %305 = vrot.lane.b32.xlu1 %v1294_v27, %s1450_s16 }
 0x382   :  { %v239_v28 = vpop.permute.xlu0 %238 }
 0x383   :  { %v241_v29 = vmul.f32 %v239_v28, %v232_v16 }
 0x385   :  { %243 = vrot.lane.b32.xlu2 %v241_v29, %s1451_s17 }
 0x389   :  { %v306_v30 = vpop.permute.xlu1 %305 }
 0x38a   :  { %v308_v31 = vmul.f32 %v306_v30, %v299_v25 }
 0x38c   :  { %310 = vrot.lane.b32.xlu0 %v308_v31, %s1451_s17 }
 0x3df   :  { %v244_v34 = vpop.permute.xlu2 %243 }
 0x3e0   :  { %v1678_v42 = vadd.f32 %v244_v34, %v236_v32 }
 0x3e2   :  { %1363 = vtanh.f32 %v1678_v42 }
 0x3e8   :  { %v1364_v43 = vpop.eup %1363 }
 0x3e9   :  { %249 = vrot.lane.b32.xlu1 %v1364_v43, %s1450_s16 }
 0x3fe   :  { %v311_v46 = vpop.permute.xlu0 %310 }
 0x3ff   :  { %v1682_v47 = vadd.f32 %v311_v46, %v303_v45 }
 0x401   :  { %1365 = vtanh.f32 %v1682_v47 }
 0x407   :  { %v1366_v48 = vpop.eup %1365 }
 0x408   :  { %316 = vrot.lane.b32.xlu2 %v1366_v48, %s1450_s16 }
 0x410   :  { %62 = vperm.xlu2 %1342, %v43_v33  }
 0x45b   :  { %v250_v49 = vpop.permute.xlu1 %249 }
 0x45c   :  { %v252_v50 = vmul.f32 %v250_v49, %v232_v16 }
 0x45e   :  { %321 = vrot.lane.b32.xlu0 %v252_v50, %s1451_s17 }
 0x462   :  { %v317_v51 = vpop.permute.xlu2 %316 }
 0x463   :  { %v319_v52 = vmul.f32 %v317_v51, %v299_v25 }
 0x465   :  { %386 = vrot.lane.b32.xlu1 %v319_v52, %s1450_s16 }
 0x4d0   :  { %v322_v53 = vpop.permute.xlu0 %321 }
 0x4d1   :  { %1295 = vmatmul.msk.f32.vlgmr.msrb.gmra.mxu3 %vm126_vm4, %v322_v53 }
 0x4d2   :  { %861 = vmatpush.msrb.mxu3 %v1520_v0  ;;  %v63_v0 = vpop.permute.xlu2 %62 }
 0x4d4   :  { %862 = vmatpush.msrb.mxu3 %v1525_v1  ;;  %v95_v1 = vmul.f32 %v1559_v7, %v63_v0 }
 0x4d6   :  { %863 = vmatpush.msrb.mxu3 %v1535_v4  ;;  %v107_v4 = vadd.f32 %v1565_v10, %v95_v1 }
 0x4d7   :  { %v387_v55 = vpop.permute.xlu1 %386 }
 0x4d8   :  { %v389_v56 = vsel %vm126_vm4, %v322_v53, %v387_v55  ;;  %864 = vmatpush.msrb.mxu3 %v1542_v5 }
 0x4d9   :  { %1298 = vmatmul.msk.f32.vlgmr.msra.gmra.mxu0 %vm258_vm5, %v389_v56 }
 0x4da   :  { %925 = vmatpush.msra.mxu0 %v1577_v35 }
 0x4dc   :  { %926 = vmatpush.msra.mxu0 %v1582_v36 }
 0x4de   :  { %927 = vmatpush.msra.mxu0 %v1589_v37 }
 0x4e0   :  { %928 = vmatpush.msra.mxu0 %v1597_v38 }
 0x4e2   :  { %929 = vmatpush.msra.mxu0 %v1605_v39 }
 0x4e4   :  { %930 = vmatpush.msra.mxu0 %v1613_v40 }
 0x4e6   :  { %931 = vmatpush.msra.mxu0 %v1621_v41 }
 0x4e8   :  { %932 = vmatpush.msra.mxu0 %v1634_v44 }
 0x554   :  { %v342_v5 = vpop.f32.mrf.mxu3 }
 0x555   :  { %v345_v57 = vadd.f32 %v342_v5, %v107_v4 }
 0x556   :  { %v410_v58 = vpop.f32.mrf.mxu0 }
 0x557   :  { %v1296_v59 = vmul.f32 -1.442695, %v345_v57  ;;  %v411_v60 = vadd.f32 %v1670_v54, %v410_v58 }
 0x559   :  { %1367 = vpow2.f32 %v1296_v59  ;;  %v1299_v61 = vmul.f32 -1.442695, %v411_v60 }
 0x55b   :  { %1369 = vpow2.f32 %v1299_v61 }
 0x55f   :  { %v1368_v62 = vpop.eup %1367 }
 0x560   :  { %v349_v63 = vadd.f32 1.0, %v1368_v62 }
 0x561   :  { %v1370_v2 = vpop.eup %1369 }
 0x562   :  { %1371 = vrcp.f32 %v349_v63  ;;  %v416_v3 = vadd.f32 1.0, %v1370_v2  ;;  %v361_v13 = vand.u32 2147483648, %v349_v63  ;;  %v359_v16 = vand.u32 2147483647, %v349_v63 }
 0x563   :  { %vm355_vm15 = vweird.f32 %v349_v63 }
 0x564   :  { %1373 = vrcp.f32 %v416_v3  ;;  %v428_v17 = vand.u32 2147483648, %v416_v3  ;;  %v426_v20 = vand.u32 2147483647, %v416_v3  ;;  %v362_v21 = vor.u32 1.1754944e-38, %v361_v13 }
 0x565   :  { %vm360_vm2 = vcmp.eq.f32.partialorder %v359_v16, 8.507059e+37  ;;  %vm422_vm3 = vweird.f32 %v416_v3 }
 0x566   :  { %v429_v25 = vor.u32 1.1754944e-38, %v428_v17  ;;  %vm427_vm7 = vcmp.eq.f32.partialorder %v426_v20, 8.507059e+37 }
 0x568   :  { %v1372_v6 = vpop.eup %1371 }
 0x569   :  { %v351_v8 = vmul.f32 %v1372_v6, %v349_v63  ;;  %vm356_vm14 = vweird.f32 %v1372_v6 }
 0x56a   :  { %v1374_v9 = vpop.eup %1373  ;;  %vm357_vm1 = vmor %vm355_vm15, %vm356_vm14 }
 0x56b   :  { %v352_v11 = vsub.f32 1.0, %v351_v8  ;;  %v418_v12 = vmul.f32 %v1374_v9, %v416_v3  ;;  %vm423_vm0 = vweird.f32 %v1374_v9 }
 0x56c   :  { %vm424_vm6 = vmor %vm422_vm3, %vm423_vm0 }
 0x56d   :  { %v419_v14 = vsub.f32 1.0, %v418_v12  ;;  %v353_v15 = vmul.f32 %v1372_v6, %v352_v11 }
 0x56f   :  { %v354_v18 = vadd.f32 %v1372_v6, %v353_v15  ;;  %v420_v19 = vmul.f32 %v1374_v9, %v419_v14 }
 0x571   :  { %v358_v22 = vsel %vm357_vm1, %v1372_v6, %v354_v18  ;;  %v421_v23 = vadd.f32 %v1374_v9, %v420_v19 }
 0x572   :  { %v363_v24 = vsel %vm360_vm2, %v362_v21, %v358_v22 }
 0x573   :  { %v365_v26 = vmul.f32 2.0, %v363_v24  ;;  %v425_v27 = vsel %vm424_vm6, %v1374_v9, %v421_v23  ;;  %v367_v46 = vmul.f32 %v363_v24, %v1678_v42  ;;  %v44_v42 = vld [vmem:[%s1954_s0 + $0x18] sm:$0xff] }
 0x574   :  { %v430_v28 = vsel %vm427_vm7, %v429_v25, %v425_v27 }
 0x575   :  { %v1297_v29 = vadd.f32 -1.0, %v365_v26  ;;  %v432_v30 = vmul.f32 2.0, %v430_v28  ;;  %v434_v50 = vmul.f32 %v430_v28, %v1682_v47 }
 0x577   :  { %369 = vrot.lane.b32.xlu0 %v1297_v29, %s1450_s16  ;;  %v1300_v31 = vadd.f32 -1.0, %v432_v30 }
 0x579   :  { %436 = vrot.lane.b32.xlu1 %v1300_v31, %s1450_s16 }
 0x5e9   :  { %v370_v32 = vpop.permute.xlu0 %369 }
 0x5ea   :  { %v372_v34 = vmul.f32 %v370_v32, %v363_v24 }
 0x5eb   :  { %v437_v43 = vpop.permute.xlu1 %436 }
 0x5ec   :  { %v439_v45 = vmul.f32 %v437_v43, %v430_v28  ;;  %374 = vrot.lane.b32.xlu2 %v372_v34, %s1451_s17 }
 0x5ee   :  { %441 = vrot.lane.b32.xlu0 %v439_v45, %s1451_s17 }
 0x646   :  { %v375_v48 = vpop.permute.xlu2 %374 }
 0x647   :  { %v1714_v33 = vadd.f32 %v375_v48, %v367_v46 }
 0x649   :  { %1375 = vtanh.f32 %v1714_v33 }
 0x64f   :  { %v1376_v49 = vpop.eup %1375 }
 0x650   :  { %380 = vrot.lane.b32.xlu1 %v1376_v49, %s1450_s16 }
 0x660   :  { %v442_v51 = vpop.permute.xlu0 %441 }
 0x661   :  { %v1719_v52 = vadd.f32 %v442_v51, %v434_v50 }
 0x663   :  { %1377 = vtanh.f32 %v1719_v52 }
 0x669   :  { %v1378_v53 = vpop.eup %1377 }
 0x66a   :  { %447 = vrot.lane.b32.xlu2 %v1378_v53, %s1450_s16 }
 0x672   :  { %67 = vperm.xlu2 %1342, %v44_v42  }
 0x6c2   :  { %v381_v55 = vpop.permute.xlu1 %380 }
 0x6c3   :  { %v383_v56 = vmul.f32 %v381_v55, %v363_v24 }
 0x6c4   :  { %v448_v0 = vpop.permute.xlu2 %447 }
 0x6c5   :  { %v450_v1 = vmul.f32 %v448_v0, %v430_v28  ;;  %452 = vrot.lane.b32.xlu0 %v383_v56, %s1451_s17 }
 0x6c7   :  { %517 = vrot.lane.b32.xlu1 %v450_v1, %s1450_s16 }
 0x6cc   :  { %v68_v57 = vpop.permute.xlu2 %67 }
 0x6cd   :  { %v96_v58 = vmul.f32 %v1559_v7, %v68_v57 }
 0x6cf   :  { %v108_v59 = vadd.f32 %v1565_v10, %v96_v58 }
 0x737   :  { %v453_v47 = vpop.permute.xlu0 %452 }
 0x738   :  { %1301 = vmatmul.msk.f32.vlgmr.msrb.gmra.mxu1 %vm126_vm4, %v453_v47 }
 0x739   :  { %v518_v4 = vpop.permute.xlu1 %517  ;;  %794 = vmatpush.msrb.mxu1 %v1577_v35 }
 0x73a   :  { %v520_v5 = vsel %vm126_vm4, %v453_v47, %v518_v4 }
 0x73b   :  { %1304 = vmatmul.msk.f32.vlgmr.msra.gmra.mxu3 %vm258_vm5, %v520_v5  ;;  %795 = vmatpush.msrb.mxu1 %v1582_v36 }
 0x73c   :  { %1056 = vmatpush.msra.mxu3 %v1577_v35 }
 0x73d   :  { %796 = vmatpush.msrb.mxu1 %v1589_v37 }
 0x73e   :  { %1057 = vmatpush.msra.mxu3 %v1582_v36 }
 0x73f   :  { %797 = vmatpush.msrb.mxu1 %v1597_v38 }
 0x740   :  { %1058 = vmatpush.msra.mxu3 %v1589_v37 }
 0x741   :  { %798 = vmatpush.msrb.mxu1 %v1605_v39 }
 0x742   :  { %1059 = vmatpush.msra.mxu3 %v1597_v38 }
 0x743   :  { %799 = vmatpush.msrb.mxu1 %v1613_v40 }
 0x744   :  { %1060 = vmatpush.msra.mxu3 %v1605_v39 }
 0x745   :  { %800 = vmatpush.msrb.mxu1 %v1621_v41 }
 0x746   :  { %1061 = vmatpush.msra.mxu3 %v1613_v40 }
 0x747   :  { %801 = vmatpush.msrb.mxu1 %v1634_v44 }
 0x748   :  { %1062 = vmatpush.msra.mxu3 %v1621_v41 }
 0x74a   :  { %1063 = vmatpush.msra.mxu3 %v1634_v44 }
 0x7b5   :  { %v473_v60 = vpop.f32.mrf.mxu1 }
 0x7b6   :  { %v476_v61 = vadd.f32 %v473_v60, %v108_v59 }
 0x7b8   :  { %v1302_v62 = vmul.f32 -1.442695, %v476_v61 }
 0x7ba   :  { %1379 = vpow2.f32 %v1302_v62 }
 0x7be   :  { %v541_v63 = vpop.f32.mrf.mxu3 }
 0x7bf   :  { %v542_v2 = vadd.f32 %v1670_v54, %v541_v63 }
 0x7c0   :  { %v1380_v3 = vpop.eup %1379 }
 0x7c1   :  { %v480_v6 = vadd.f32 1.0, %v1380_v3  ;;  %v1305_v8 = vmul.f32 -1.442695, %v542_v2 }
 0x7c3   :  { %1381 = vrcp.f32 %v480_v6  ;;  %v492_v15 = vand.u32 2147483648, %v480_v6  ;;  %v490_v17 = vand.u32 2147483647, %v480_v6  ;;  %vm486_vm9 = vweird.f32 %v480_v6 }
 0x7c4   :  { %1383 = vpow2.f32 %v1305_v8 }
 0x7c5   :  { %v493_v19 = vor.u32 1.1754944e-38, %v492_v15  ;;  %vm491_vm11 = vcmp.eq.f32.partialorder %v490_v17, 8.507059e+37 }
 0x7c9   :  { %v1382_v9 = vpop.eup %1381 }
 0x7ca   :  { %v1384_v11 = vpop.eup %1383  ;;  %v482_v12 = vmul.f32 %v1382_v9, %v480_v6  ;;  %vm487_vm8 = vweird.f32 %v1382_v9 }
 0x7cb   :  { %v547_v13 = vadd.f32 1.0, %v1384_v11  ;;  %vm488_vm10 = vmor %vm486_vm9, %vm487_vm8 }
 0x7cc   :  { %v483_v14 = vsub.f32 1.0, %v482_v12 }
 0x7cd   :  { %1385 = vrcp.f32 %v547_v13  ;;  %v559_v27 = vand.u32 2147483648, %v547_v13  ;;  %v557_v29 = vand.u32 2147483647, %v547_v13  ;;  %vm553_vm13 = vweird.f32 %v547_v13 }
 0x7ce   :  { %v484_v16 = vmul.f32 %v1382_v9, %v483_v14 }
 0x7cf   :  { %v560_v31 = vor.u32 1.1754944e-38, %v559_v27  ;;  %vm558_vm15 = vcmp.eq.f32.partialorder %v557_v29, 8.507059e+37 }
 0x7d0   :  { %v485_v18 = vadd.f32 %v1382_v9, %v484_v16 }
 0x7d2   :  { %v489_v20 = vsel %vm488_vm10, %v1382_v9, %v485_v18 }
 0x7d3   :  { %v1386_v21 = vpop.eup %1385  ;;  %v494_v22 = vsel %vm491_vm11, %v493_v19, %v489_v20 }
 0x7d4   :  { %v549_v23 = vmul.f32 %v1386_v21, %v547_v13  ;;  %v496_v24 = vmul.f32 2.0, %v494_v22  ;;  %vm554_vm12 = vweird.f32 %v1386_v21  ;;  %v498_v51 = vmul.f32 %v494_v22, %v1714_v33  ;;  %v45_v33 = vld [vmem:[%s1954_s0 + $0x20] sm:$0xff] }
 0x7d5   :  { %vm555_vm14 = vmor %vm553_vm13, %vm554_vm12 }
 0x7d6   :  { %v550_v25 = vsub.f32 1.0, %v549_v23  ;;  %v1303_v26 = vadd.f32 -1.0, %v496_v24 }
 0x7d8   :  { %500 = vrot.lane.b32.xlu0 %v1303_v26, %s1450_s16  ;;  %v551_v28 = vmul.f32 %v1386_v21, %v550_v25 }
 0x7da   :  { %v552_v30 = vadd.f32 %v1386_v21, %v551_v28 }
 0x7dc   :  { %v556_v32 = vsel %vm555_vm14, %v1386_v21, %v552_v30 }
 0x7dd   :  { %v561_v34 = vsel %vm558_vm15, %v560_v31, %v556_v32 }
 0x7de   :  { %v563_v43 = vmul.f32 2.0, %v561_v34  ;;  %v565_v56 = vmul.f32 %v561_v34, %v1719_v52 }
 0x7e0   :  { %v1306_v45 = vadd.f32 -1.0, %v563_v43 }
 0x7e2   :  { %567 = vrot.lane.b32.xlu1 %v1306_v45, %s1450_s16 }
 0x84a   :  { %v501_v46 = vpop.permute.xlu0 %500 }
 0x84b   :  { %v503_v48 = vmul.f32 %v501_v46, %v494_v22 }
 0x84d   :  { %505 = vrot.lane.b32.xlu2 %v503_v48, %s1451_s17 }
 0x854   :  { %v568_v49 = vpop.permute.xlu1 %567 }
 0x855   :  { %v570_v50 = vmul.f32 %v568_v49, %v561_v34 }
 0x857   :  { %572 = vrot.lane.b32.xlu0 %v570_v50, %s1451_s17 }
 0x8a7   :  { %v506_v53 = vpop.permute.xlu2 %505 }
 0x8a8   :  { %v1755_v42 = vadd.f32 %v506_v53, %v498_v51 }
 0x8aa   :  { %1387 = vtanh.f32 %v1755_v42 }
 0x8b0   :  { %v1388_v55 = vpop.eup %1387 }
 0x8b1   :  { %511 = vrot.lane.b32.xlu1 %v1388_v55, %s1450_s16 }
 0x8c9   :  { %v573_v0 = vpop.permute.xlu0 %572 }
 0x8ca   :  { %v1760_v1 = vadd.f32 %v573_v0, %v565_v56 }
 0x8cc   :  { %1389 = vtanh.f32 %v1760_v1 }
 0x8d2   :  { %v1390_v47 = vpop.eup %1389 }
 0x8d3   :  { %578 = vrot.lane.b32.xlu2 %v1390_v47, %s1450_s16 }
 0x8db   :  { %72 = vperm.xlu2 %1342, %v45_v33  }
 0x923   :  { %v512_v4 = vpop.permute.xlu1 %511 }
 0x924   :  { %v514_v5 = vmul.f32 %v512_v4, %v494_v22 }
 0x926   :  { %583 = vrot.lane.b32.xlu0 %v514_v5, %s1451_s17 }
 0x92d   :  { %v579_v57 = vpop.permute.xlu2 %578 }
 0x92e   :  { %v581_v58 = vmul.f32 %v579_v57, %v561_v34 }
 0x930   :  { %648 = vrot.lane.b32.xlu1 %v581_v58, %s1450_s16 }
 0x998   :  { %v584_v52 = vpop.permute.xlu0 %583 }
 0x999   :  { %1307 = vmatmul.msk.f32.vlgmr.msra.gmra.mxu1 %vm126_vm4, %v584_v52 }
 0x99a   :  { %1126 = vmatpush.msra.mxu1 %v1577_v35  ;;  %v73_v35 = vpop.permute.xlu2 %72 }
 0x99c   :  { %1127 = vmatpush.msra.mxu1 %v1582_v36  ;;  %v97_v36 = vmul.f32 %v1559_v7, %v73_v35 }
 0x99e   :  { %1128 = vmatpush.msra.mxu1 %v1589_v37  ;;  %v109_v37 = vadd.f32 %v1565_v10, %v97_v36 }
 0x9a0   :  { %1129 = vmatpush.msra.mxu1 %v1597_v38 }
 0x9a2   :  { %v649_v59 = vpop.permute.xlu1 %648  ;;  %1130 = vmatpush.msra.mxu1 %v1605_v39 }
 0x9a3   :  { %v651_v60 = vsel %vm126_vm4, %v584_v52, %v649_v59 }
 0x9a4   :  { %1310 = vmatmul.msk.f32.vlgmr.msrb.gmra.mxu2 %vm258_vm5, %v651_v60  ;;  %1131 = vmatpush.msra.mxu1 %v1613_v40 }
 0x9a6   :  { %1132 = vmatpush.msra.mxu1 %v1621_v41 }
 0x9a8   :  { %1133 = vmatpush.msra.mxu1 %v1634_v44 }
 0xa16   :  { %v604_v61 = vpop.f32.mrf.mxu1 }
 0xa17   :  { %v607_v38 = vadd.f32 %v604_v61, %v109_v37 }
 0xa19   :  { %v1308_v62 = vmul.f32 -1.442695, %v607_v38 }
 0xa1b   :  { %1391 = vpow2.f32 %v1308_v62 }
 0xa21   :  { %v1392_v39 = vpop.eup %1391 }
 0xa22   :  { %v611_v63 = vadd.f32 1.0, %v1392_v39 }
 0xa24   :  { %1393 = vrcp.f32 %v611_v63  ;;  %v623_v8 = vand.u32 2147483648, %v611_v63  ;;  %v621_v11 = vand.u32 2147483647, %v611_v63  ;;  %vm617_vm1 = vweird.f32 %v611_v63 }
 0xa26   :  { %v624_v14 = vor.u32 1.1754944e-38, %v623_v8  ;;  %vm622_vm3 = vcmp.eq.f32.partialorder %v621_v11, 8.507059e+37 }
 0xa27   :  { %v672_v2 = vpop.f32.mrf.mxu2 }
 0xa28   :  { %v673_v3 = vadd.f32 %v1670_v54, %v672_v2 }
 0xa2a   :  { %v1394_v40 = vpop.eup %1393  ;;  %v1311_v6 = vmul.f32 -1.442695, %v673_v3 }
 0xa2b   :  { %v613_v41 = vmul.f32 %v1394_v40, %v611_v63  ;;  %vm618_vm0 = vweird.f32 %v1394_v40 }
 0xa2c   :  { %1395 = vpow2.f32 %v1311_v6  ;;  %vm619_vm2 = vmor %vm617_vm1, %vm618_vm0 }
 0xa2d   :  { %v614_v44 = vsub.f32 1.0, %v613_v41 }
 0xa2f   :  { %v615_v9 = vmul.f32 %v1394_v40, %v614_v44 }
 0xa31   :  { %v616_v12 = vadd.f32 %v1394_v40, %v615_v9 }
 0xa32   :  { %v1396_v13 = vpop.eup %1395 }
 0xa33   :  { %v678_v15 = vadd.f32 1.0, %v1396_v13  ;;  %v620_v16 = vsel %vm619_vm2, %v1394_v40, %v616_v12 }
 0xa34   :  { %v625_v17 = vsel %vm622_vm3, %v624_v14, %v620_v16 }
 0xa35   :  { %1397 = vrcp.f32 %v678_v15  ;;  %v627_v18 = vmul.f32 2.0, %v625_v17  ;;  %v690_v23 = vand.u32 2147483648, %v678_v15  ;;  %v688_v25 = vand.u32 2147483647, %v678_v15 }
 0xa36   :  { %vm684_vm7 = vweird.f32 %v678_v15  ;;  %v629_v46 = vmul.f32 %v625_v17, %v1755_v42  ;;  %v46_v42 = vld [vmem:[%s1954_s0 + $0x28] sm:$0xff] }
 0xa37   :  { %v1309_v19 = vadd.f32 -1.0, %v627_v18  ;;  %v691_v27 = vor.u32 1.1754944e-38, %v690_v23  ;;  %vm689_vm9 = vcmp.eq.f32.partialorder %v688_v25, 8.507059e+37 }
 0xa39   :  { %631 = vrot.lane.b32.xlu0 %v1309_v19, %s1450_s16 }
 0xa3b   :  { %v1398_v20 = vpop.eup %1397 }
 0xa3c   :  { %v680_v21 = vmul.f32 %v1398_v20, %v678_v15  ;;  %vm685_vm6 = vweird.f32 %v1398_v20 }
 0xa3d   :  { %vm686_vm8 = vmor %vm684_vm7, %vm685_vm6 }
 0xa3e   :  { %v681_v22 = vsub.f32 1.0, %v680_v21 }
 0xa40   :  { %v682_v24 = vmul.f32 %v1398_v20, %v681_v22 }
 0xa42   :  { %v683_v26 = vadd.f32 %v1398_v20, %v682_v24 }
 0xa44   :  { %v687_v28 = vsel %vm686_vm8, %v1398_v20, %v683_v26 }
 0xa45   :  { %v692_v29 = vsel %vm689_vm9, %v691_v27, %v687_v28 }
 0xa46   :  { %v694_v30 = vmul.f32 2.0, %v692_v29  ;;  %v696_v51 = vmul.f32 %v692_v29, %v1760_v1 }
 0xa48   :  { %v1312_v31 = vadd.f32 -1.0, %v694_v30 }
 0xa4a   :  { %698 = vrot.lane.b32.xlu1 %v1312_v31, %s1450_s16 }
 0xaab   :  { %v632_v32 = vpop.permute.xlu0 %631 }
 0xaac   :  { %v634_v34 = vmul.f32 %v632_v32, %v625_v17 }
 0xaae   :  { %636 = vrot.lane.b32.xlu2 %v634_v34, %s1451_s17 }
 0xabc   :  { %v699_v43 = vpop.permute.xlu1 %698 }
 0xabd   :  { %v701_v45 = vmul.f32 %v699_v43, %v692_v29 }
 0xabf   :  { %703 = vrot.lane.b32.xlu0 %v701_v45, %s1451_s17 }
 0xb08   :  { %v637_v48 = vpop.permute.xlu2 %636 }
 0xb09   :  { %v1788_v49 = vadd.f32 %v637_v48, %v629_v46 }
 0xb0b   :  { %1399 = vtanh.f32 %v1788_v49 }
 0xb11   :  { %v1400_v50 = vpop.eup %1399 }
 0xb12   :  { %642 = vrot.lane.b32.xlu1 %v1400_v50, %s1450_s16 }
 0xb31   :  { %v704_v53 = vpop.permute.xlu0 %703 }
 0xb32   :  { %v1793_v55 = vadd.f32 %v704_v53, %v696_v51 }
 0xb34   :  { %1401 = vtanh.f32 %v1793_v55 }
 0xb3a   :  { %v1402_v56 = vpop.eup %1401 }
 0xb3b   :  { %709 = vrot.lane.b32.xlu2 %v1402_v56, %s1450_s16 }
 0xb43   :  { %77 = vperm.xlu2 %1342, %v46_v42  }
 0xb84   :  { %v643_v0 = vpop.permute.xlu1 %642 }
 0xb85   :  { %v645_v47 = vmul.f32 %v643_v0, %v625_v17 }
 0xb87   :  { %714 = vrot.lane.b32.xlu0 %v645_v47, %s1451_s17 }
 0xb95   :  { %v710_v33 = vpop.permute.xlu2 %709 }
 0xb96   :  { %v712_v4 = vmul.f32 %v710_v33, %v692_v29  ;;  %v1833_v33 = vld [vmem:[%s1955_s1] ss:$0 sm:$0xff] }
 0xb98   :  { %779 = vrot.lane.b32.xlu1 %v712_v4, %s1450_s16 }
 0xb9d   :  { %v78_v58 = vpop.permute.xlu2 %77 }
 0xb9e   :  { %v98_v52 = vmul.f32 %v1559_v7, %v78_v58 }
 0xba0   :  { %v110_v59 = vadd.f32 %v1565_v10, %v98_v52 }
 0xbf9   :  { %v715_v1 = vpop.permute.xlu0 %714 }
 0xbfa   :  { %1313 = vmatmul.msk.f32.vlgmr.msrb.gmra.mxu0 %vm126_vm4, %v715_v1 }
 0xc0a   :  { %v780_v5 = vpop.permute.xlu1 %779 }
 0xc0b   :  { %v782_v57 = vsel %vm126_vm4, %v715_v1, %v780_v5  ;;  %v1839_v1 = vld [vmem:[%s1956_s3] ss:$0 sm:$0xff] }
 0xc0c   :  { %1316 = vmatmul.msk.f32.vlgmr.msrb.gmra.mxu1 %vm258_vm5, %v782_v57 }
 0xc77   :  { %v735_v60 = vpop.f32.mrf.mxu0 }
 0xc78   :  { %v738_v35 = vadd.f32 %v735_v60, %v110_v59 }
 0xc7a   :  { %v1314_v36 = vmul.f32 -1.442695, %v738_v35 }
 0xc7c   :  { %1403 = vpow2.f32 %v1314_v36 }
 0xc82   :  { %v1404_v37 = vpop.eup %1403 }
 0xc83   :  { %v742_v61 = vadd.f32 1.0, %v1404_v37 }
 0xc85   :  { %1405 = vrcp.f32 %v742_v61  ;;  %v754_v40 = vand.u32 2147483648, %v742_v61  ;;  %v752_v7 = vand.u32 2147483647, %v742_v61  ;;  %vm748_vm11 = vweird.f32 %v742_v61 }
 0xc87   :  { %v755_v41 = vor.u32 1.1754944e-38, %v754_v40  ;;  %vm753_vm13 = vcmp.eq.f32.partialorder %v752_v7, 8.507059e+37 }
 0xc89   :  { %v803_v38 = vpop.f32.mrf.mxu1 }
 0xc8a   :  { %v804_v62 = vadd.f32 %v1670_v54, %v803_v38 }
 0xc8b   :  { %v1406_v39 = vpop.eup %1405 }
 0xc8c   :  { %v744_v63 = vmul.f32 %v1406_v39, %v742_v61  ;;  %v1317_v2 = vmul.f32 -1.442695, %v804_v62  ;;  %vm749_vm10 = vweird.f32 %v1406_v39 }
 0xc8d   :  { %vm750_vm12 = vmor %vm748_vm11, %vm749_vm10 }
 0xc8e   :  { %v745_v3 = vsub.f32 1.0, %v744_v63  ;;  %1407 = vpow2.f32 %v1317_v2 }
 0xc90   :  { %v746_v6 = vmul.f32 %v1406_v39, %v745_v3 }
 0xc92   :  { %v747_v10 = vadd.f32 %v1406_v39, %v746_v6 }
 0xc94   :  { %v1408_v44 = vpop.eup %1407  ;;  %v751_v8 = vsel %vm750_vm12, %v1406_v39, %v747_v10 }
 0xc95   :  { %v809_v9 = vadd.f32 1.0, %v1408_v44  ;;  %v756_v11 = vsel %vm753_vm13, %v755_v41, %v751_v8 }
 0xc96   :  { %v758_v12 = vmul.f32 2.0, %v756_v11  ;;  %v760_v30 = vmul.f32 %v756_v11, %v1788_v49  ;;  %v47_v49 = vld [vmem:[%s1954_s0 + $0x30] sm:$0xff] }
 0xc97   :  { %1409 = vrcp.f32 %v809_v9  ;;  %v821_v17 = vand.u32 2147483648, %v809_v9  ;;  %v819_v19 = vand.u32 2147483647, %v809_v9  ;;  %vm815_vm15 = vweird.f32 %v809_v9 }
 0xc98   :  { %v1315_v13 = vadd.f32 -1.0, %v758_v12 }
 0xc99   :  { %v822_v21 = vor.u32 1.1754944e-38, %v821_v17  ;;  %vm820_vm1 = vcmp.eq.f32.partialorder %v819_v19, 8.507059e+37 }
 0xc9a   :  { %762 = vrot.lane.b32.xlu0 %v1315_v13, %s1450_s16 }
 0xc9d   :  { %v1410_v14 = vpop.eup %1409 }
 0xc9e   :  { %v811_v15 = vmul.f32 %v1410_v14, %v809_v9  ;;  %vm816_vm14 = vweird.f32 %v1410_v14 }
 0xc9f   :  { %vm817_vm0 = vmor %vm815_vm15, %vm816_vm14 }
 0xca0   :  { %v812_v16 = vsub.f32 1.0, %v811_v15 }
 0xca2   :  { %v813_v18 = vmul.f32 %v1410_v14, %v812_v16 }
 0xca4   :  { %v814_v20 = vadd.f32 %v1410_v14, %v813_v18 }
 0xca6   :  { %v818_v22 = vsel %vm817_vm0, %v1410_v14, %v814_v20 }
 0xca7   :  { %v823_v23 = vsel %vm820_vm1, %v822_v21, %v818_v22 }
 0xca8   :  { %v825_v24 = vmul.f32 2.0, %v823_v23  ;;  %v827_v43 = vmul.f32 %v823_v23, %v1793_v55 }
 0xcaa   :  { %v1318_v25 = vadd.f32 -1.0, %v825_v24 }
 0xcac   :  { %829 = vrot.lane.b32.xlu1 %v1318_v25, %s1450_s16 }
 0xd0c   :  { %v763_v26 = vpop.permute.xlu0 %762 }
 0xd0d   :  { %v765_v27 = vmul.f32 %v763_v26, %v756_v11 }
 0xd0f   :  { %767 = vrot.lane.b32.xlu2 %v765_v27, %s1451_s17 }
 0xd1e   :  { %v830_v28 = vpop.permute.xlu1 %829 }
 0xd1f   :  { %v832_v29 = vmul.f32 %v830_v28, %v823_v23 }
 0xd21   :  { %834 = vrot.lane.b32.xlu0 %v832_v29, %s1451_s17 }
 0xd69   :  { %v768_v31 = vpop.permute.xlu2 %767 }
 0xd6a   :  { %v1813_v32 = vadd.f32 %v768_v31, %v760_v30 }
 0xd6c   :  { %1411 = vtanh.f32 %v1813_v32 }
 0xd72   :  { %v1412_v34 = vpop.eup %1411 }
 0xd73   :  { %773 = vrot.lane.b32.xlu1 %v1412_v34, %s1450_s16 }
 0xd93   :  { %v835_v45 = vpop.permute.xlu0 %834 }
 0xd94   :  { %v1818_v46 = vadd.f32 %v835_v45, %v827_v43 }
 0xd96   :  { %1413 = vtanh.f32 %v1818_v46 }
 0xd9c   :  { %v1414_v48 = vpop.eup %1413 }
 0xd9d   :  { %840 = vrot.lane.b32.xlu2 %v1414_v48, %s1450_s16 }
 0xda5   :  { %82 = vperm.xlu2 %1342, %v47_v49  }
 0xde5   :  { %v774_v50 = vpop.permute.xlu1 %773 }
 0xde6   :  { %v776_v51 = vmul.f32 %v774_v50, %v756_v11 }
 0xde8   :  { %845 = vrot.lane.b32.xlu0 %v776_v51, %s1451_s17 }
 0xdf7   :  { %v841_v53 = vpop.permute.xlu2 %840 }
 0xdf8   :  { %v843_v56 = vmul.f32 %v841_v53, %v823_v23 }
 0xdfa   :  { %910 = vrot.lane.b32.xlu1 %v843_v56, %s1450_s16 }
 0xdff   :  { %v83_v47 = vpop.permute.xlu2 %82 }
 0xe00   :  { %v99_v4 = vmul.f32 %v1833_v33, %v83_v47 }
 0xe02   :  { %v111_v5 = vadd.f32 %v1839_v1, %v99_v4 }
 0xe5a   :  { %v846_v55 = vpop.permute.xlu0 %845 }
 0xe5b   :  { %1319 = vmatmul.msk.f32.vlgmr.msrb.gmra.mxu3 %vm126_vm4, %v846_v55 }
 0xe6c   :  { %v911_v42 = vpop.permute.xlu1 %910 }
 0xe6d   :  { %v913_v0 = vsel %vm126_vm4, %v846_v55, %v911_v42 }
 0xe6e   :  { %1322 = vmatmul.msk.f32.vlgmr.msra.gmra.mxu0 %vm258_vm5, %v913_v0 }
 0xede   :  { %v866_v57 = vpop.f32.mrf.mxu3 }
 0xedf   :  { %v869_v58 = vadd.f32 %v866_v57, %v111_v5 }
 0xee1   :  { %v1320_v52 = vmul.f32 -1.442695, %v869_v58  ;;  %v1870_v58 = vld [vmem:[%s1958_s5] ss:$0 sm:$0xff] }
 0xee3   :  { %1415 = vpow2.f32 %v1320_v52 }
 0xee9   :  { %v1416_v59 = vpop.eup %1415 }
 0xeea   :  { %v873_v60 = vadd.f32 1.0, %v1416_v59 }
 0xeeb   :  { %v934_v35 = vpop.f32.mrf.mxu0 }
 0xeec   :  { %1417 = vrcp.f32 %v873_v60  ;;  %v935_v36 = vadd.f32 %v1670_v54, %v934_v35  ;;  %v885_v63 = vand.u32 2147483648, %v873_v60  ;;  %v883_v40 = vand.u32 2147483647, %v873_v60 }
 0xeed   :  { %vm879_vm3 = vweird.f32 %v873_v60 }
 0xeee   :  { %v1323_v37 = vmul.f32 -1.442695, %v935_v36  ;;  %v886_v7 = vor.u32 1.1754944e-38, %v885_v63  ;;  %vm884_vm7 = vcmp.eq.f32.partialorder %v883_v40, 8.507059e+37 }
 0xef0   :  { %1419 = vpow2.f32 %v1323_v37 }
 0xef2   :  { %v1418_v61 = vpop.eup %1417 }
 0xef3   :  { %v875_v38 = vmul.f32 %v1418_v61, %v873_v60  ;;  %vm880_vm2 = vweird.f32 %v1418_v61 }
 0xef4   :  { %vm881_vm6 = vmor %vm879_vm3, %vm880_vm2 }
 0xef5   :  { %v876_v62 = vsub.f32 1.0, %v875_v38 }
 0xef6   :  { %v1420_v39 = vpop.eup %1419 }
 0xef7   :  { %v940_v2 = vadd.f32 1.0, %v1420_v39  ;;  %v877_v3 = vmul.f32 %v1418_v61, %v876_v62 }
 0xef9   :  { %1421 = vrcp.f32 %v940_v2  ;;  %v878_v6 = vadd.f32 %v1418_v61, %v877_v3  ;;  %v952_v12 = vand.u32 2147483648, %v940_v2  ;;  %v950_v14 = vand.u32 2147483647, %v940_v2 }
 0xefa   :  { %vm946_vm9 = vweird.f32 %v940_v2 }
 0xefb   :  { %v882_v10 = vsel %vm881_vm6, %v1418_v61, %v878_v6  ;;  %v953_v16 = vor.u32 1.1754944e-38, %v952_v12  ;;  %vm951_vm11 = vcmp.eq.f32.partialorder %v950_v14, 8.507059e+37 }
 0xefc   :  { %v887_v41 = vsel %vm884_vm7, %v886_v7, %v882_v10 }
 0xefd   :  { %v889_v54 = vmul.f32 2.0, %v887_v41  ;;  %v891_v25 = vmul.f32 %v887_v41, %v1813_v32  ;;  %v48_v32 = vld [vmem:[%s1954_s0 + $0x38] sm:$0xff] }
 0xeff   :  { %v1422_v44 = vpop.eup %1421  ;;  %v1321_v8 = vadd.f32 -1.0, %v889_v54 }
 0xf00   :  { %v942_v9 = vmul.f32 %v1422_v44, %v940_v2  ;;  %vm947_vm8 = vweird.f32 %v1422_v44 }
 0xf01   :  { %893 = vrot.lane.b32.xlu0 %v1321_v8, %s1450_s16  ;;  %vm948_vm10 = vmor %vm946_vm9, %vm947_vm8 }
 0xf02   :  { %v943_v11 = vsub.f32 1.0, %v942_v9 }
 0xf04   :  { %v944_v13 = vmul.f32 %v1422_v44, %v943_v11 }
 0xf06   :  { %v945_v15 = vadd.f32 %v1422_v44, %v944_v13 }
 0xf08   :  { %v949_v17 = vsel %vm948_vm10, %v1422_v44, %v945_v15 }
 0xf09   :  { %v954_v18 = vsel %vm951_vm11, %v953_v16, %v949_v17  ;;  %vm1281_vm11 = vcmask 31744  }
 0xf0a   :  { %v956_v19 = vmul.f32 2.0, %v954_v18  ;;  %v958_v29 = vmul.f32 %v954_v18, %v1818_v46 }
 0xf0c   :  { %v1324_v20 = vadd.f32 -1.0, %v956_v19 }
 0xf0e   :  { %960 = vrot.lane.b32.xlu1 %v1324_v20, %s1450_s16 }
 0xf73   :  { %v894_v21 = vpop.permute.xlu0 %893 }
 0xf74   :  { %v896_v22 = vmul.f32 %v894_v21, %v887_v41 }
 0xf76   :  { %898 = vrot.lane.b32.xlu2 %v896_v22, %s1451_s17 }
 0xf80   :  { %v961_v23 = vpop.permute.xlu1 %960 }
 0xf81   :  { %v963_v24 = vmul.f32 %v961_v23, %v954_v18 }
 0xf83   :  { %965 = vrot.lane.b32.xlu0 %v963_v24, %s1451_s17 }
 0xfd0   :  { %v899_v26 = vpop.permute.xlu2 %898 }
 0xfd1   :  { %v1848_v27 = vadd.f32 %v899_v26, %v891_v25 }
 0xfd3   :  { %1423 = vtanh.f32 %v1848_v27 }
 0xfd9   :  { %v1424_v28 = vpop.eup %1423 }
 0xfda   :  { %904 = vrot.lane.b32.xlu1 %v1424_v28, %s1450_s16 }
 0xff5   :  { %v966_v30 = vpop.permute.xlu0 %965 }
 0xff6   :  { %v1853_v31 = vadd.f32 %v966_v30, %v958_v29 }
 0xff8   :  { %1425 = vtanh.f32 %v1853_v31 }
 0xffe   :  { %v1426_v34 = vpop.eup %1425 }
 0xfff   :  { %971 = vrot.lane.b32.xlu2 %v1426_v34, %s1450_s16 }
0x1007   :  { %87 = vperm.xlu2 %1342, %v48_v32  }
0x104c   :  { %v905_v43 = vpop.permute.xlu1 %904 }
0x104d   :  { %v907_v45 = vmul.f32 %v905_v43, %v887_v41 }
0x104f   :  { %976 = vrot.lane.b32.xlu0 %v907_v45, %s1451_s17 }
0x1059   :  { %v972_v48 = vpop.permute.xlu2 %971 }
0x105a   :  { %v974_v49 = vmul.f32 %v972_v48, %v954_v18 }
0x105c   :  { %1041 = vrot.lane.b32.xlu1 %v974_v49, %s1450_s16 }
0x1061   :  { %v88_v53 = vpop.permute.xlu2 %87 }
0x1062   :  { %v100_v56 = vmul.f32 %v1833_v33, %v88_v53 }
0x1064   :  { %v112_v55 = vadd.f32 %v1839_v1, %v100_v56 }
0x10c1   :  { %v977_v46 = vpop.permute.xlu0 %976 }
0x10c2   :  { %1325 = vmatmul.msk.f32.vlgmr.msra.gmra.mxu2 %vm126_vm4, %v977_v46 }
0x10ce   :  { %v1042_v50 = vpop.permute.xlu1 %1041 }
0x10cf   :  { %v1044_v51 = vsel %vm126_vm4, %v977_v46, %v1042_v50 }
0x10d0   :  { %1328 = vmatmul.msk.f32.vlgmr.msra.gmra.mxu3 %vm258_vm5, %v1044_v51 }
0x1145   :  { %v997_v42 = vpop.f32.mrf.mxu2 }
0x1146   :  { %v1000_v0 = vadd.f32 %v997_v42, %v112_v55 }
0x1148   :  { %v1326_v47 = vmul.f32 -1.442695, %v1000_v0 }
0x114a   :  { %1427 = vpow2.f32 %v1326_v47 }
0x1150   :  { %v1428_v4 = vpop.eup %1427 }
0x1151   :  { %v1004_v5 = vadd.f32 1.0, %v1428_v4 }
0x1153   :  { %1429 = vrcp.f32 %v1004_v5  ;;  %v1065_v57 = vpop.f32.mrf.mxu3  ;;  %v1016_v35 = vand.u32 2147483648, %v1004_v5  ;;  %v1014_v61 = vand.u32 2147483647, %v1004_v5  ;;  %vm1010_vm13 = vweird.f32 %v1004_v5 }
0x1154   :  { %v1066_v52 = vadd.f32 %v1870_v58, %v1065_v57 }
0x1155   :  { %v1017_v39 = vor.u32 1.1754944e-38, %v1016_v35  ;;  %vm1015_vm15 = vcmp.eq.f32.partialorder %v1014_v61, 8.507059e+37  ;;  %v1177_v61 = vld [vmem:[%s1960_s6 + $0x8] sm:$0xff] }
0x1156   :  { %v1329_v59 = vmul.f32 -1.442695, %v1066_v52 }
0x1158   :  { %1431 = vpow2.f32 %v1329_v59 }
0x1159   :  { %v1430_v33 = vpop.eup %1429 }
0x115a   :  { %v1006_v60 = vmul.f32 %v1430_v33, %v1004_v5  ;;  %vm1011_vm12 = vweird.f32 %v1430_v33 }
0x115b   :  { %vm1012_vm14 = vmor %vm1010_vm13, %vm1011_vm12 }
0x115c   :  { %v1007_v1 = vsub.f32 1.0, %v1006_v60 }
0x115e   :  { %v1432_v36 = vpop.eup %1431  ;;  %v1008_v37 = vmul.f32 %v1430_v33, %v1007_v1 }
0x115f   :  { %v1071_v38 = vadd.f32 1.0, %v1432_v36  ;;  %v1179_v36 = vld [vmem:[%s1960_s6 + $0x18] sm:$0xff] }
0x1160   :  { %v1009_v62 = vadd.f32 %v1430_v33, %v1008_v37  ;;  %v1178_v37 = vld [vmem:[%s1960_s6 + $0x10] sm:$0xff]  ;;  %1201 = vmatpush.msrb.mxu2 %v1179_v36 }
0x1161   :  { %1433 = vrcp.f32 %v1071_v38  ;;  %v1083_v41 = vand.u32 2147483648, %v1071_v38  ;;  %v1081_v44 = vand.u32 2147483647, %v1071_v38  ;;  %vm1077_vm1 = vweird.f32 %v1071_v38 }
0x1162   :  { %v1013_v63 = vsel %vm1012_vm14, %v1430_v33, %v1009_v62  ;;  %1202 = vmatpush.msrb.mxu2 %v1178_v37 }
0x1163   :  { %v1018_v2 = vsel %vm1015_vm15, %v1017_v39, %v1013_v63  ;;  %v1084_v9 = vor.u32 1.1754944e-38, %v1083_v41  ;;  %vm1082_vm3 = vcmp.eq.f32.partialorder %v1081_v44, 8.507059e+37  ;;  %v1219_v63 = vld [vmem:[%s1961_s8 + $0x38] sm:$0xff]  ;;  %v1213_v41 = vld [vmem:[%s1961_s8 + $0x8] sm:$0xff] }
0x1164   :  { %v1020_v3 = vmul.f32 2.0, %v1018_v2  ;;  %v1022_v19 = vmul.f32 %v1018_v2, %v1848_v27  ;;  %1203 = vmatpush.msrb.mxu2 %v1177_v61  ;;  %1235 = vmatpush.msrb.mxu0 %v1219_v63  ;;  %v1253_v44 = vld [vmem:[%s1963_s10 + $0x18] sm:$0xff] }
0x1166   :  { %v1327_v40 = vadd.f32 -1.0, %v1020_v3  ;;  %v1217_v3 = vld [vmem:[%s1961_s8 + $0x28] sm:$0xff] }
0x1167   :  { %v1434_v6 = vpop.eup %1433 }
0x1168   :  { %v1073_v7 = vmul.f32 %v1434_v6, %v1071_v38  ;;  %1024 = vrot.lane.b32.xlu0 %v1327_v40, %s1450_s16  ;;  %vm1078_vm0 = vweird.f32 %v1434_v6  ;;  %v1176_v38 = vld [vmem:[%s1960_s6] sm:$0xff] }
0x1169   :  { %vm1079_vm2 = vmor %vm1077_vm1, %vm1078_vm0  ;;  %1204 = vmatpush.msrb.mxu2 %v1176_v38  ;;  %v1216_v40 = vld [vmem:[%s1961_s8 + $0x20] sm:$0xff] }
0x116a   :  { %v1074_v10 = vsub.f32 1.0, %v1073_v7 }
0x116b   :  { %1273 = vmatpush.msra.mxu2 %v1253_v44 }
0x116c   :  { %v1075_v54 = vmul.f32 %v1434_v6, %v1074_v10  ;;  %v1214_v10 = vld [vmem:[%s1961_s8 + $0x10] sm:$0xff] }
0x116e   :  { %v1076_v8 = vadd.f32 %v1434_v6, %v1075_v54  ;;  %v1212_v54 = vld [vmem:[%s1961_s8] sm:$0xff] }
0x1170   :  { %v1080_v11 = vsel %vm1079_vm2, %v1434_v6, %v1076_v8  ;;  %v1215_v6 = vld [vmem:[%s1961_s8 + $0x18] sm:$0xff]  ;;  %v1346_v8 = vld [vmem:[%s1959_s7] ss:$0 sm:$0xff] }
0x1171   :  { %v1085_v12 = vsel %vm1082_vm3, %v1084_v9, %v1080_v11 }
0x1172   :  { %v1087_v13 = vmul.f32 2.0, %v1085_v12  ;;  %v1089_v23 = vmul.f32 %v1085_v12, %v1853_v31 }
0x1174   :  { %v1330_v14 = vadd.f32 -1.0, %v1087_v13 }
0x1176   :  { %1091 = vrot.lane.b32.xlu1 %v1330_v14, %s1450_s16  ;;  %v1252_v14 = vld [vmem:[%s1963_s10 + $0x10] sm:$0xff] }
0x1177   :  { %1274 = vmatpush.msra.mxu2 %v1252_v14 }
0x11da   :  { %v1025_v15 = vpop.permute.xlu0 %1024 }
0x11db   :  { %v1027_v16 = vmul.f32 %v1025_v15, %v1018_v2  ;;  %v1251_v15 = vld [vmem:[%s1963_s10 + $0x8] sm:$0xff] }
0x11dc   :  { %1275 = vmatpush.msra.mxu2 %v1251_v15 }
0x11dd   :  { %1029 = vrot.lane.b32.xlu2 %v1027_v16, %s1451_s17  ;;  %v1250_v16 = vld [vmem:[%s1963_s10] sm:$0xff] }
0x11de   :  { %1276 = vmatpush.msra.mxu2 %v1250_v16 }
0x11e8   :  { %v1092_v17 = vpop.permute.xlu1 %1091 }
0x11e9   :  { %v1094_v18 = vmul.f32 %v1092_v17, %v1085_v12  ;;  %v1347_v17 = vld [vmem:[%s1962_s9] ss:$0 sm:$0xff] }
0x11eb   :  { %1096 = vrot.lane.b32.xlu0 %v1094_v18, %s1451_s17 }
0x1237   :  { %v1030_v20 = vpop.permute.xlu2 %1029 }
0x1238   :  { %v1032_v21 = vadd.f32 %v1030_v20, %v1022_v19 }
0x123a   :  { %1435 = vtanh.f32 %v1032_v21 }
0x1240   :  { %v1436_v22 = vpop.eup %1435 }
0x1241   :  { %1035 = vrot.lane.b32.xlu1 %v1436_v22, %s1450_s16  ;;  %v1348_v22 = vld [vmem:[%s1964_s11] ss:$0 sm:$0xff] }
0x125d   :  { %v1097_v24 = vpop.permute.xlu0 %1096 }
0x125e   :  { %v1099_v25 = vadd.f32 %v1097_v24, %v1089_v23 }
0x1260   :  { %1437 = vtanh.f32 %v1099_v25 }
0x1266   :  { %v1438_v26 = vpop.eup %1437 }
0x1267   :  { %1102 = vrot.lane.b32.xlu2 %v1438_v26, %s1450_s16 }
0x12b3   :  { %v1036_v28 = vpop.permute.xlu1 %1035 }
0x12b4   :  { %v1038_v29 = vmul.f32 %v1036_v28, %v1018_v2  ;;  %v1218_v2 = vld [vmem:[%s1961_s8 + $0x30] sm:$0xff] }
0x12b5   :  { %1236 = vmatpush.msrb.mxu0 %v1218_v2 }
0x12b6   :  { %1107 = vrot.lane.b32.xlu0 %v1038_v29, %s1451_s17 }
0x12b7   :  { %1237 = vmatpush.msrb.mxu0 %v1217_v3 }
0x12b9   :  { %1238 = vmatpush.msrb.mxu0 %v1216_v40 }
0x12bb   :  { %1239 = vmatpush.msrb.mxu0 %v1215_v6 }
0x12bd   :  { %1240 = vmatpush.msrb.mxu0 %v1214_v10 }
0x12bf   :  { %1241 = vmatpush.msrb.mxu0 %v1213_v41 }
0x12c1   :  { %v1103_v30 = vpop.permute.xlu2 %1102  ;;  %1242 = vmatpush.msrb.mxu0 %v1212_v54 }
0x12c2   :  { %v1105_v27 = vmul.f32 %v1103_v30, %v1085_v12 }
0x12c4   :  { %1111 = vrot.lane.b32.xlu1 %v1105_v27, %s1450_s16 }
0x1328   :  { %v1108_v34 = vpop.permute.xlu0 %1107 }
0x1336   :  { %v1112_v32 = vpop.permute.xlu1 %1111 }
0x1337   :  { %v1114_v43 = vsel %vm126_vm4, %v1108_v34, %v1112_v32 }
0x1338   :  { %1331 = vmatmul.msk.f32.vlgmr.msra.gmra.mxu1 %vm258_vm5, %v1114_v43 }
0x13b5   :  { %v1135_v31 = vpop.f32.mrf.mxu1 }
0x13b6   :  { %v1136_v45 = vadd.f32 %v1870_v58, %v1135_v31 }
0x13b8   :  { %v1332_v48 = vmul.f32 -1.442695, %v1136_v45 }
0x13ba   :  { %1439 = vpow2.f32 %v1332_v48 }
0x13c0   :  { %v1440_v49 = vpop.eup %1439 }
0x13c1   :  { %v1141_v46 = vadd.f32 1.0, %v1440_v49 }
0x13c3   :  { %1441 = vrcp.f32 %v1141_v46  ;;  %v1153_v56 = vand.u32 2147483648, %v1141_v46  ;;  %v1151_v42 = vand.u32 2147483647, %v1141_v46  ;;  %vm1147_vm7 = vweird.f32 %v1141_v46 }
0x13c5   :  { %v1154_v47 = vor.u32 1.1754944e-38, %v1153_v56  ;;  %vm1152_vm9 = vcmp.eq.f32.partialorder %v1151_v42, 8.507059e+37 }
0x13c9   :  { %v1442_v50 = vpop.eup %1441 }
0x13ca   :  { %v1143_v51 = vmul.f32 %v1442_v50, %v1141_v46  ;;  %vm1148_vm6 = vweird.f32 %v1442_v50 }
0x13cb   :  { %vm1149_vm8 = vmor %vm1147_vm7, %vm1148_vm6 }
0x13cc   :  { %v1144_v53 = vsub.f32 1.0, %v1143_v51 }
0x13ce   :  { %v1145_v55 = vmul.f32 %v1442_v50, %v1144_v53 }
0x13d0   :  { %v1146_v0 = vadd.f32 %v1442_v50, %v1145_v55 }
0x13d2   :  { %v1150_v4 = vsel %vm1149_vm8, %v1442_v50, %v1146_v0 }
0x13d3   :  { %v1155_v5 = vsel %vm1152_vm9, %v1154_v47, %v1150_v4 }
0x13d4   :  { %v1157_v57 = vmul.f32 2.0, %v1155_v5  ;;  %v1159_v33 = vmul.f32 %v1155_v5, %v1099_v25 }
0x13d6   :  { %v1333_v58 = vadd.f32 -1.0, %v1157_v57 }
0x13d8   :  { %1161 = vrot.lane.b32.xlu2 %v1333_v58, %s1450_s16 }
0x1432   :  { %v1162_v52 = vpop.permute.xlu2 %1161 }
0x1433   :  { %v1164_v59 = vmul.f32 %v1162_v52, %v1155_v5 }
0x1435   :  { %1166 = vrot.lane.b32.xlu0 %v1164_v59, %s1451_s17 }
0x14a7   :  { %v1167_v60 = vpop.permute.xlu0 %1166 }
0x14a8   :  { %v1169_v1 = vadd.f32 %v1167_v60, %v1159_v33 }
0x14aa   :  { %1443 = vtanh.f32 %v1169_v1 }
0x14b0   :  { %v1444_v35 = vpop.eup %1443 }
0x14b1   :  { %1172 = vrot.lane.b32.xlu1 %v1444_v35, %s1450_s16 }
0x1523   :  { %v1173_v62 = vpop.permute.xlu1 %1172 }
0x1524   :  { %v1175_v39 = vmul.f32 %v1173_v62, %v1155_v5 }
0x1526   :  { %1185 = vrot.lane.b32.xlu2 %v1175_v39, %s1451_s17 }
0x1580   :  { %v1186_v7 = vpop.permute.xlu2 %1185 }
0x1581   :  { %1334 = vmatmul.msk.f32.vlgmr.msrb.gmra.mxu2 %vm126_vm4, %v1186_v7 }
0x1604   :  { %v1206_v9 = vpop.f32.mrf.mxu2 }
0x1605   :  { %v1207_v11 = vadd.f32 %v1346_v8, %v1206_v9 }
0x1607   :  { %vm1209_vm10 = vcmp.ge.f32.partialorder %v1207_v11, 0.0  ;;  %v1210_v12 = vmul.f32 0.01, %v1207_v11 }
0x1609   :  { %v1211_v13 = vsel %vm1209_vm10, %v1207_v11, %v1210_v12 }
0x160a   :  { %1335 = vmatmul.msk.f32.vlgmr.msrb.gmra.mxu0 %vm258_vm5, %v1211_v13 }
0x1687   :  { %v1244_v18 = vpop.f32.mrf.mxu0 }
0x1688   :  { %v1245_v19 = vadd.f32 %v1347_v17, %v1244_v18 }
0x168a   :  { %vm1247_vm5 = vcmp.ge.f32.partialorder %v1245_v19, 0.0  ;;  %v1248_v20 = vmul.f32 0.01, %v1245_v19 }
0x168c   :  { %v1249_v21 = vsel %vm1247_vm5, %v1245_v19, %v1248_v20 }
0x168d   :  { %1336 = vmatmul.msk.f32.vlgmr.msra.gmra.mxu2 %vm126_vm4, %v1249_v21 }
0x1710   :  { %v1278_v23 = vpop.f32.mrf.mxu2 }
0x1711   :  { %v1279_v24 = vadd.f32 %v1348_v22, %v1278_v23 }
0x1713   :  { %1282 = vst.msk [vmem:[%s1965_s12] sm:$0xff] %vm1281_vm11, %v1279_v24 }

</bundles_post_ra>
